<compile_context>
chip_gen: v7x
topology: tpu7x:2x2x1
jax: 0.10.0
libtpu: 0.0.40
codegen_flags: <defaults>
</compile_context>

<pallas_src>
import functools

import jax
import jax.numpy as jnp
from jax.experimental import pallas as pl
from jax.experimental.pallas import tpu as pltpu

GROUPS = 8          # nn.GroupNorm(8, ...)
EPS = 1e-5          # GroupNorm default eps
SLOPE = 0.01        # nn.LeakyReLU default negative_slope


def _leaky(x):
    return jnp.where(x > 0, x, SLOPE * x)


def _group_norm(x, mnorm, gamma, beta, inv_n):
    """GroupNorm on a (C, HW) f32 tile.

    mnorm: (C, C) same-group indicator pre-divided by (HW * C/GROUPS), or None
           when C/GROUPS == 1 (per-channel stats -> no MXU matmul at all).
    gamma, beta: (C, 1).
    Single stats pass: per-channel sum and sum-of-squares, then ONE
    (C,C)@(C,2) dot; var = E[x^2] - mean^2.
    """
    s = jnp.sum(x, axis=1, keepdims=True)                    # (C, 1)
    ss = jnp.sum(x * x, axis=1, keepdims=True)               # (C, 1)
    if mnorm is None:
        mean = s * inv_n
        msq = ss * inv_n
    else:
        stats = jnp.dot(mnorm, jnp.concatenate([s, ss], axis=1),
                        preferred_element_type=jnp.float32)  # (C, 2)
        mean = stats[:, 0:1]
        msq = stats[:, 1:2]
    var = msq - mean * mean
    return (x - mean) * (jax.lax.rsqrt(var + EPS) * gamma) + beta


def _shift_flat(x, d):
    """s[:, p] = x[:, p + d] for 0 <= p + d < HW, else 0 (static d)."""
    if d == 0:
        return x
    c, hw = x.shape
    z = jnp.zeros((c, abs(d)), x.dtype)
    if d > 0:
        return jnp.concatenate([x[:, d:], z], axis=1)
    return jnp.concatenate([z, x[:, :hw + d]], axis=1)


def _conv3x3(x, w_bf, bias, mask_l, mask_r, width):
    """3x3 / stride 1 / SAME conv on a (Cin, HW) f32 tile via im2col.

    w_bf:  (Cout, 9*Cin) bfloat16, column order (ky*3 + kx)*Cin + ci.
    bias:  (Cout, 1) f32.
    mask_l / mask_r: (1, HW) border masks (col 0 / col W-1 invalid).
    Decomposition: horizontal shift+mask once per kx column, then pure vertical
    shifts (their zero-fill is exactly the invalid top/bottom row), then one
    large-K MXU matmul with f32 accumulation.
    """
    xl = (_shift_flat(x, -1) * mask_l).astype(jnp.bfloat16)   # kx == 0 taps
    xc = x.astype(jnp.bfloat16)                               # kx == 1 taps (no mask)
    xr = (_shift_flat(x, 1) * mask_r).astype(jnp.bfloat16)    # kx == 2 taps
    cols = (xl, xc, xr)
    taps = [_shift_flat(cols[kx], (ky - 1) * width)
            for ky in range(3) for kx in range(3)]            # k = ky*3 + kx
    patch = jnp.concatenate(taps, axis=0)                     # (9*Cin, HW) bf16
    return jnp.dot(w_bf, patch, preferred_element_type=jnp.float32) + bias


def _drb_kernel(x_ref, vec_ref, m1_ref, m2_ref, w1_ref, w2_ref, mask_ref, o_ref,
                *, width, cin, cout, batch_block, gn1_diag, gn2_diag, inv_hw):
    vec = vec_ref[...]                                        # (Cmax, 6) packed consts
    g1, b1 = vec[:cin, 0:1], vec[:cin, 1:2]
    g2, b2 = vec[:cout, 2:3], vec[:cout, 3:4]
    c1b, c2b = vec[:cout, 4:5], vec[:cout, 5:6]
    mask_l = mask_ref[0:1, :]
    mask_r = mask_ref[1:2, :]
    w1 = w1_ref[...]                                          # bf16
    w2 = w2_ref[...]                                          # bf16
    m1 = None if gn1_diag else m1_ref[...]
    m2 = None if gn2_diag else m2_ref[...]

    # Unrolled batch loop: independent chains interleave on a single TensorCore.
    for b in range(batch_block):
        x = x_ref[b].astype(jnp.float32)                      # (Cin, HW)

        # GroupNorm1 + LeakyReLU
        a1 = _leaky(_group_norm(x, m1, g1, b1, inv_hw))

        # Conv1 (also the residual). Keep y1 in registers for GN2, park a copy
        # in the output block so it is not live across conv2's patch build.
        y1 = _conv3x3(a1, w1, c1b, mask_l, mask_r, width)     # (Cout, HW) f32
        o_ref[b] = y1

        # GroupNorm2 + LeakyReLU (from the register value, not a VMEM re-read)
        a2 = _leaky(_group_norm(y1, m2, g2, b2, inv_hw))

        # Conv2 + residual add (residual re-read from VMEM)
        o_ref[b] = o_ref[b] + _conv3x3(a2, w2, c2b, mask_l, mask_r, width)


def _same_group_matrix(c, hw):
    """(C, C) indicator of 'same GroupNorm group', pre-divided by count."""
    cg = c // GROUPS
    idx = jnp.arange(c)
    m = (idx[:, None] // cg == idx[None, :] // cg).astype(jnp.float32)
    return m / float(cg * hw)


@functools.partial(jax.jit, static_argnames=("batch_block",))
def down_residual_block(x_nchw, params, batch_block=None):
    """NCHW in / NCHW out, like the PyTorch module.  No layout transposes:
    the kernel consumes NCHW directly as lane-dense (C, H*W) tiles.

    batch_block: batch elements per grid step.  None (default) folds the whole
    batch into one step (best on single-TC v5e/v6e); use 1 on v7x so both
    TensorCores get grid steps.
    """
    n, cin, h, w = x_nchw.shape
    hw = h * w
    cout = params["w1"].shape[-1]
    cmax = max(cin, cout)

    bb = n if batch_block is None else batch_block
    assert n % bb == 0, (n, bb)

    x = x_nchw.reshape(n, cin, hw).astype(jnp.float32)

    # HWIO (3,3,Ci,Co) -> (Co, 9*Ci), tap-major then ci (matches im2col patch).
    # bf16 operands, f32 MXU accumulation.
    w1 = jnp.transpose(params["w1"], (3, 0, 1, 2)).reshape(cout, 9 * cin).astype(jnp.bfloat16)
    w2 = jnp.transpose(params["w2"], (3, 0, 1, 2)).reshape(cout, 9 * cout).astype(jnp.bfloat16)

    # Pack the 6 per-channel constant vectors into one (Cmax, 6) operand:
    # cols = [gamma1, beta1, gamma2, beta2, conv1_bias, conv2_bias].
    def _col(v, c):
        v = v.reshape(c).astype(jnp.float32)
        return jnp.pad(v, (0, cmax - c))

    vecs = jnp.stack(
        [_col(params["gamma1"], cin), _col(params["beta1"], cin),
         _col(params["gamma2"], cout), _col(params["beta2"], cout),
         _col(params["b1"], cout), _col(params["b2"], cout)], axis=1)   # (Cmax, 6)

    m1 = _same_group_matrix(cin, hw)           # (Cin, Cin)   (unused if diag)
    m2 = _same_group_matrix(cout, hw)          # (Cout, Cout) (unused if diag)

    # Only two distinct horizontal border masks exist.
    xx = jnp.arange(hw) % w
    mask_lr = jnp.stack([(xx > 0), (xx < w - 1)]).astype(jnp.float32)   # (2, HW)

    gn1_diag = (cin // GROUPS) == 1            # group size 1 -> per-channel stats
    gn2_diag = (cout // GROUPS) == 1

    kernel = functools.partial(
        _drb_kernel, width=w, cin=cin, cout=cout, batch_block=bb,
        gn1_diag=gn1_diag, gn2_diag=gn2_diag, inv_hw=1.0 / hw)

    const = lambda i: (0, 0)
    out = pl.pallas_call(
        kernel,
        out_shape=jax.ShapeDtypeStruct((n, cout, hw), jnp.float32),
        grid_spec=pltpu.PrefetchScalarGridSpec(
            num_scalar_prefetch=0,
            grid=(n // bb,),
            in_specs=[
                pl.BlockSpec((bb, cin, hw), lambda i: (i, 0, 0)),   # x
                pl.BlockSpec((cmax, 6), const),                     # packed per-channel consts
                pl.BlockSpec((cin, cin), const),                    # group indicator 1
                pl.BlockSpec((cout, cout), const),                  # group indicator 2
                pl.BlockSpec((cout, 9 * cin), const),               # conv1 weight (bf16)
                pl.BlockSpec((cout, 9 * cout), const),              # conv2 weight (bf16)
                pl.BlockSpec((2, hw), const),                       # border masks
            ],
            out_specs=pl.BlockSpec((bb, cout, hw), lambda i: (i, 0, 0)),
        ),
        compiler_params=pltpu.CompilerParams(
            dimension_semantics=("parallel",)),   # batch steps independent
    )(x, vecs, m1, m2, w1, w2, mask_lr)

    return out.reshape(n, cout, h, w)


# ----------------------------- pure-JAX reference -----------------------------
def _ref_forward(x_nchw, params):
    x = jnp.transpose(x_nchw, (0, 2, 3, 1)).astype(jnp.float32)   # NHWC

    def gn(x, gamma, beta):
        nb, h, w, c = x.shape
        xg = x.reshape(nb, h * w, GROUPS, c // GROUPS)
        mean = xg.mean(axis=(1, 3), keepdims=True)
        var = xg.var(axis=(1, 3), keepdims=True)
        xn = ((xg - mean) / jnp.sqrt(var + EPS)).reshape(nb, h, w, c)
        return xn * gamma.reshape(1, 1, 1, c) + beta.reshape(1, 1, 1, c)

    def conv(x, w, b):
        y = jax.lax.conv_general_dilated(
            x, w, (1, 1), "SAME",
            dimension_numbers=("NHWC", "HWIO", "NHWC"))
        return y + b.reshape(1, 1, 1, -1)

    a1 = _leaky(gn(x, params["gamma1"], params["beta1"]))
    x2 = conv(a1, params["w1"], params["b1"])
    a2 = _leaky(gn(x2, params["gamma2"], params["beta2"]))
    y = conv(a2, params["w2"], params["b2"]) + x2
    return jnp.transpose(y, (0, 3, 1, 2))


if __name__ == "__main__":
    # GroupNorm(8, C) requires channels divisible by 8.
    N, CIN, COUT, H, W = 2, 8, 16, 16, 16

    key = jax.random.PRNGKey(0)
    ks = jax.random.split(key, 9)
    params = {
        "gamma1": 1.0 + 0.1 * jax.random.normal(ks[0], (CIN,), jnp.float32),
        "beta1": 0.1 * jax.random.normal(ks[1], (CIN,), jnp.float32),
        "w1": 0.1 * jax.random.normal(ks[2], (3, 3, CIN, COUT), jnp.float32),   # HWIO
        "b1": 0.1 * jax.random.normal(ks[3], (COUT,), jnp.float32),
        "gamma2": 1.0 + 0.1 * jax.random.normal(ks[4], (COUT,), jnp.float32),
        "beta2": 0.1 * jax.random.normal(ks[5], (COUT,), jnp.float32),
        "w2": 0.1 * jax.random.normal(ks[6], (3, 3, COUT, COUT), jnp.float32),  # HWIO
        "b2": 0.1 * jax.random.normal(ks[7], (COUT,), jnp.float32),
    }
    x = jax.random.normal(ks[8], (N, CIN, H, W), jnp.float32)     # NCHW like PyTorch

    out = down_residual_block(x, params)
    out = jax.block_until_ready(out)

    ref = _ref_forward(x, params)
    assert out.shape == (N, COUT, H, W), out.shape
    # bf16 conv operands (f32 accumulate) -> bf16-appropriate tolerance.
    assert jnp.allclose(out, ref, atol=3e-2, rtol=3e-2), (
        float(jnp.max(jnp.abs(out - ref))))

    print("KERNEL_OK")
</pallas_src>

<mosaic_0001>
module attributes {stable_mosaic.version = 11 : i64} {
  func.func @_drb_kernel(%arg0: i32, %arg1: memref<2x8x256xf32, #tpu.memory_space<vmem>>, %arg2: memref<16x6xf32, #tpu.memory_space<vmem>>, %arg3: memref<8x8xf32, #tpu.memory_space<vmem>>, %arg4: memref<16x16xf32, #tpu.memory_space<vmem>>, %arg5: memref<16x72xbf16, #tpu.memory_space<vmem>>, %arg6: memref<16x144xbf16, #tpu.memory_space<vmem>>, %arg7: memref<2x256xf32, #tpu.memory_space<vmem>>, %arg8: memref<2x16x256xf32, #tpu.memory_space<vmem>>) attributes {dimension_semantics = [#tpu.dimension_semantics<parallel>], iteration_bounds = array<i64: 1>, scalar_prefetch = 0 : i64, scratch_operands = 0 : i64, tpu.core_type = #tpu.core_type<tc>, window_params = [{transform_indices = @transform_0, window_bounds = array<i64: 2, 8, 256>}, {pipeline_mode = #tpu.pipeline_mode<synchronous>, transform_indices = @transform_1, window_bounds = array<i64: 16, 6>}, {pipeline_mode = #tpu.pipeline_mode<synchronous>, transform_indices = @transform_2, window_bounds = array<i64: 8, 8>}, {pipeline_mode = #tpu.pipeline_mode<synchronous>, transform_indices = @transform_3, window_bounds = array<i64: 16, 16>}, {pipeline_mode = #tpu.pipeline_mode<synchronous>, transform_indices = @transform_4, window_bounds = array<i64: 16, 72>}, {pipeline_mode = #tpu.pipeline_mode<synchronous>, transform_indices = @transform_5, window_bounds = array<i64: 16, 144>}, {pipeline_mode = #tpu.pipeline_mode<synchronous>, transform_indices = @transform_6, window_bounds = array<i64: 2, 256>}, {transform_indices = @transform_7, window_bounds = array<i64: 2, 16, 256>}]} {
    %c0 = arith.constant 0 : index
    %c0_0 = arith.constant 0 : index
    %0 = vector.load %arg2[%c0, %c0_0] : memref<16x6xf32, #tpu.memory_space<vmem>>, vector<16x6xf32>
    %1 = vector.extract_strided_slice %0 {offsets = [0, 0], sizes = [8, 1], strides = [1, 1]} : vector<16x6xf32> to vector<8x1xf32>
    %2 = vector.extract_strided_slice %0 {offsets = [0, 1], sizes = [8, 1], strides = [1, 1]} : vector<16x6xf32> to vector<8x1xf32>
    %3 = vector.extract_strided_slice %0 {offsets = [0, 2], sizes = [16, 1], strides = [1, 1]} : vector<16x6xf32> to vector<16x1xf32>
    %4 = vector.extract_strided_slice %0 {offsets = [0, 3], sizes = [16, 1], strides = [1, 1]} : vector<16x6xf32> to vector<16x1xf32>
    %5 = vector.extract_strided_slice %0 {offsets = [0, 4], sizes = [16, 1], strides = [1, 1]} : vector<16x6xf32> to vector<16x1xf32>
    %6 = vector.extract_strided_slice %0 {offsets = [0, 5], sizes = [16, 1], strides = [1, 1]} : vector<16x6xf32> to vector<16x1xf32>
    %c0_1 = arith.constant 0 : index
    %c0_2 = arith.constant 0 : index
    %7 = vector.load %arg7[%c0_1, %c0_2] : memref<2x256xf32, #tpu.memory_space<vmem>>, vector<1x256xf32>
    %c1 = arith.constant 1 : index
    %c0_3 = arith.constant 0 : index
    %8 = vector.load %arg7[%c1, %c0_3] : memref<2x256xf32, #tpu.memory_space<vmem>>, vector<1x256xf32>
    %c0_4 = arith.constant 0 : index
    %c0_5 = arith.constant 0 : index
    %9 = vector.load %arg5[%c0_4, %c0_5] : memref<16x72xbf16, #tpu.memory_space<vmem>>, vector<16x72xbf16>
    %c0_6 = arith.constant 0 : index
    %c0_7 = arith.constant 0 : index
    %10 = vector.load %arg6[%c0_6, %c0_7] : memref<16x144xbf16, #tpu.memory_space<vmem>>, vector<16x144xbf16>
    %c0_8 = arith.constant 0 : index
    %c0_9 = arith.constant 0 : index
    %11 = vector.load %arg4[%c0_8, %c0_9] : memref<16x16xf32, #tpu.memory_space<vmem>>, vector<16x16xf32>
    %c0_10 = arith.constant 0 : index
    %c0_11 = arith.constant 0 : index
    %c0_12 = arith.constant 0 : index
    %12 = vector.load %arg1[%c0_10, %c0_11, %c0_12] : memref<2x8x256xf32, #tpu.memory_space<vmem>>, vector<1x8x256xf32>
    %13 = vector.shape_cast %12 : vector<1x8x256xf32> to vector<8x256xf32>
    %cst = arith.constant dense<0.000000e+00> : vector<8xf32>
    %14 = vector.multi_reduction <add>, %13, %cst [1] : vector<8x256xf32> to vector<8xf32>
    %15 = vector.shape_cast %14 : vector<8xf32> to vector<8x1xf32>
    %16 = arith.mulf %13, %13 : vector<8x256xf32>
    %cst_13 = arith.constant dense<0.000000e+00> : vector<8xf32>
    %17 = vector.multi_reduction <add>, %16, %cst_13 [1] : vector<8x256xf32> to vector<8xf32>
    %18 = vector.shape_cast %17 : vector<8xf32> to vector<8x1xf32>
    %cst_14 = arith.constant 3.906250e-03 : f32
    %19 = vector.broadcast %cst_14 : f32 to vector<8x1xf32>
    %20 = arith.mulf %15, %19 : vector<8x1xf32>
    %cst_15 = arith.constant 3.906250e-03 : f32
    %21 = vector.broadcast %cst_15 : f32 to vector<8x1xf32>
    %22 = arith.mulf %18, %21 : vector<8x1xf32>
    %23 = arith.mulf %20, %20 : vector<8x1xf32>
    %24 = arith.subf %22, %23 : vector<8x1xf32>
    %25 = vector.broadcast %20 : vector<8x1xf32> to vector<8x256xf32>
    %26 = arith.subf %13, %25 : vector<8x256xf32>
    %cst_16 = arith.constant 9.99999974E-6 : f32
    %27 = vector.broadcast %cst_16 : f32 to vector<8x1xf32>
    %28 = arith.addf %24, %27 : vector<8x1xf32>
    %29 = math.rsqrt %28 : vector<8x1xf32>
    %30 = arith.mulf %29, %1 : vector<8x1xf32>
    %31 = vector.broadcast %30 : vector<8x1xf32> to vector<8x256xf32>
    %32 = arith.mulf %26, %31 : vector<8x256xf32>
    %33 = vector.broadcast %2 : vector<8x1xf32> to vector<8x256xf32>
    %34 = arith.addf %32, %33 : vector<8x256xf32>
    %cst_17 = arith.constant 0.000000e+00 : f32
    %35 = vector.broadcast %cst_17 : f32 to vector<8x256xf32>
    %36 = arith.cmpf ogt, %34, %35 : vector<8x256xf32>
    %cst_18 = arith.constant 0.00999999977 : f32
    %37 = vector.broadcast %cst_18 : f32 to vector<8x256xf32>
    %38 = arith.mulf %37, %34 : vector<8x256xf32>
    %39 = arith.select %36, %34, %38 : vector<8x256xi1>, vector<8x256xf32>
    %cst_19 = arith.constant 0.000000e+00 : f32
    %40 = vector.broadcast %cst_19 : f32 to vector<8x1xf32>
    %41 = vector.extract_strided_slice %39 {offsets = [0, 0], sizes = [8, 255], strides = [1, 1]} : vector<8x256xf32> to vector<8x255xf32>
    %42 = tpu.concatenate %40, %41 in 1 : vector<8x1xf32>, vector<8x255xf32> -> vector<8x256xf32>
    %43 = vector.broadcast %7 : vector<1x256xf32> to vector<8x256xf32>
    %44 = arith.mulf %42, %43 : vector<8x256xf32>
    %45 = arith.truncf %44 : vector<8x256xf32> to vector<8x256xbf16>
    %46 = arith.truncf %39 : vector<8x256xf32> to vector<8x256xbf16>
    %cst_20 = arith.constant 0.000000e+00 : f32
    %47 = vector.broadcast %cst_20 : f32 to vector<8x1xf32>
    %48 = vector.extract_strided_slice %39 {offsets = [0, 1], sizes = [8, 255], strides = [1, 1]} : vector<8x256xf32> to vector<8x255xf32>
    %49 = tpu.concatenate %48, %47 in 1 : vector<8x255xf32>, vector<8x1xf32> -> vector<8x256xf32>
    %50 = vector.broadcast %8 : vector<1x256xf32> to vector<8x256xf32>
    %51 = arith.mulf %49, %50 : vector<8x256xf32>
    %52 = arith.truncf %51 : vector<8x256xf32> to vector<8x256xbf16>
    %cst_21 = arith.constant 0.000000e+00 : bf16
    %53 = vector.broadcast %cst_21 : bf16 to vector<8x16xbf16>
    %54 = vector.extract_strided_slice %45 {offsets = [0, 0], sizes = [8, 240], strides = [1, 1]} : vector<8x256xbf16> to vector<8x240xbf16>
    %55 = tpu.concatenate %53, %54 in 1 : vector<8x16xbf16>, vector<8x240xbf16> -> vector<8x256xbf16>
    %cst_22 = arith.constant 0.000000e+00 : bf16
    %56 = vector.broadcast %cst_22 : bf16 to vector<8x16xbf16>
    %57 = vector.extract_strided_slice %46 {offsets = [0, 0], sizes = [8, 240], strides = [1, 1]} : vector<8x256xbf16> to vector<8x240xbf16>
    %58 = tpu.concatenate %56, %57 in 1 : vector<8x16xbf16>, vector<8x240xbf16> -> vector<8x256xbf16>
    %cst_23 = arith.constant 0.000000e+00 : bf16
    %59 = vector.broadcast %cst_23 : bf16 to vector<8x16xbf16>
    %60 = vector.extract_strided_slice %52 {offsets = [0, 0], sizes = [8, 240], strides = [1, 1]} : vector<8x256xbf16> to vector<8x240xbf16>
    %61 = tpu.concatenate %59, %60 in 1 : vector<8x16xbf16>, vector<8x240xbf16> -> vector<8x256xbf16>
    %cst_24 = arith.constant 0.000000e+00 : bf16
    %62 = vector.broadcast %cst_24 : bf16 to vector<8x16xbf16>
    %63 = vector.extract_strided_slice %45 {offsets = [0, 16], sizes = [8, 240], strides = [1, 1]} : vector<8x256xbf16> to vector<8x240xbf16>
    %64 = tpu.concatenate %63, %62 in 1 : vector<8x240xbf16>, vector<8x16xbf16> -> vector<8x256xbf16>
    %cst_25 = arith.constant 0.000000e+00 : bf16
    %65 = vector.broadcast %cst_25 : bf16 to vector<8x16xbf16>
    %66 = vector.extract_strided_slice %46 {offsets = [0, 16], sizes = [8, 240], strides = [1, 1]} : vector<8x256xbf16> to vector<8x240xbf16>
    %67 = tpu.concatenate %66, %65 in 1 : vector<8x240xbf16>, vector<8x16xbf16> -> vector<8x256xbf16>
    %cst_26 = arith.constant 0.000000e+00 : bf16
    %68 = vector.broadcast %cst_26 : bf16 to vector<8x16xbf16>
    %69 = vector.extract_strided_slice %52 {offsets = [0, 16], sizes = [8, 240], strides = [1, 1]} : vector<8x256xbf16> to vector<8x240xbf16>
    %70 = tpu.concatenate %69, %68 in 1 : vector<8x240xbf16>, vector<8x16xbf16> -> vector<8x256xbf16>
    %71 = tpu.concatenate %55, %58, %61, %45, %46, %52, %64, %67, %70 in 0 : vector<8x256xbf16>, vector<8x256xbf16>, vector<8x256xbf16>, vector<8x256xbf16>, vector<8x256xbf16>, vector<8x256xbf16>, vector<8x256xbf16>, vector<8x256xbf16>, vector<8x256xbf16> -> vector<72x256xbf16>
    %cst_27 = arith.constant dense<0.000000e+00> : vector<16x256xf32>
    %72 = tpu.matmul %9, %71, %cst_27 {dimension_numbers = #tpu.dot_dimension_numbers<[1], [0], [0], [1], [0, 0, 1, 1], [], []>} : vector<16x72xbf16>, vector<72x256xbf16>, vector<16x256xf32> -> vector<16x256xf32>
    %73 = vector.broadcast %5 : vector<16x1xf32> to vector<16x256xf32>
    %74 = arith.addf %72, %73 : vector<16x256xf32>
    %c0_28 = arith.constant 0 : index
    %c0_29 = arith.constant 0 : index
    %c0_30 = arith.constant 0 : index
    %75 = vector.load %arg8[%c0_28, %c0_29, %c0_30] : memref<2x16x256xf32, #tpu.memory_space<vmem>>, vector<1x16x256xf32>
    %76 = vector.shape_cast %75 : vector<1x16x256xf32> to vector<16x256xf32>
    %77 = vector.shape_cast %74 : vector<16x256xf32> to vector<1x16x256xf32>
    tpu.vector_store %arg8[%c0_28, %c0_29, %c0_30], %77 {strides = array<i32>} : memref<2x16x256xf32, #tpu.memory_space<vmem>>, vector<1x16x256xf32>,
    %cst_31 = arith.constant dense<0.000000e+00> : vector<16xf32>
    %78 = vector.multi_reduction <add>, %74, %cst_31 [1] : vector<16x256xf32> to vector<16xf32>
    %79 = vector.shape_cast %78 : vector<16xf32> to vector<16x1xf32>
    %80 = arith.mulf %74, %74 : vector<16x256xf32>
    %cst_32 = arith.constant dense<0.000000e+00> : vector<16xf32>
    %81 = vector.multi_reduction <add>, %80, %cst_32 [1] : vector<16x256xf32> to vector<16xf32>
    %82 = vector.shape_cast %81 : vector<16xf32> to vector<16x1xf32>
    %83 = tpu.concatenate %79, %82 in 1 : vector<16x1xf32>, vector<16x1xf32> -> vector<16x2xf32>
    %cst_33 = arith.constant dense<0.000000e+00> : vector<16x2xf32>
    %84 = tpu.matmul %11, %83, %cst_33 {dimension_numbers = #tpu.dot_dimension_numbers<[1], [0], [0], [1], [0, 0, 1, 1], [], []>} : vector<16x16xf32>, vector<16x2xf32>, vector<16x2xf32> -> vector<16x2xf32>
    %85 = vector.extract_strided_slice %84 {offsets = [0, 0], sizes = [16, 1], strides = [1, 1]} : vector<16x2xf32> to vector<16x1xf32>
    %86 = vector.extract_strided_slice %84 {offsets = [0, 1], sizes = [16, 1], strides = [1, 1]} : vector<16x2xf32> to vector<16x1xf32>
    %87 = arith.mulf %85, %85 : vector<16x1xf32>
    %88 = arith.subf %86, %87 : vector<16x1xf32>
    %89 = vector.broadcast %85 : vector<16x1xf32> to vector<16x256xf32>
    %90 = arith.subf %74, %89 : vector<16x256xf32>
    %cst_34 = arith.constant 9.99999974E-6 : f32
    %91 = vector.broadcast %cst_34 : f32 to vector<16x1xf32>
    %92 = arith.addf %88, %91 : vector<16x1xf32>
    %93 = math.rsqrt %92 : vector<16x1xf32>
    %94 = arith.mulf %93, %3 : vector<16x1xf32>
    %95 = vector.broadcast %94 : vector<16x1xf32> to vector<16x256xf32>
    %96 = arith.mulf %90, %95 : vector<16x256xf32>
    %97 = vector.broadcast %4 : vector<16x1xf32> to vector<16x256xf32>
    %98 = arith.addf %96, %97 : vector<16x256xf32>
    %cst_35 = arith.constant 0.000000e+00 : f32
    %99 = vector.broadcast %cst_35 : f32 to vector<16x256xf32>
    %100 = arith.cmpf ogt, %98, %99 : vector<16x256xf32>
    %cst_36 = arith.constant 0.00999999977 : f32
    %101 = vector.broadcast %cst_36 : f32 to vector<16x256xf32>
    %102 = arith.mulf %101, %98 : vector<16x256xf32>
    %103 = arith.select %100, %98, %102 : vector<16x256xi1>, vector<16x256xf32>
    %c0_37 = arith.constant 0 : index
    %c0_38 = arith.constant 0 : index
    %c0_39 = arith.constant 0 : index
    %104 = vector.load %arg8[%c0_37, %c0_38, %c0_39] : memref<2x16x256xf32, #tpu.memory_space<vmem>>, vector<1x16x256xf32>
    %105 = vector.shape_cast %104 : vector<1x16x256xf32> to vector<16x256xf32>
    %cst_40 = arith.constant 0.000000e+00 : f32
    %106 = vector.broadcast %cst_40 : f32 to vector<16x1xf32>
    %107 = vector.extract_strided_slice %103 {offsets = [0, 0], sizes = [16, 255], strides = [1, 1]} : vector<16x256xf32> to vector<16x255xf32>
    %108 = tpu.concatenate %106, %107 in 1 : vector<16x1xf32>, vector<16x255xf32> -> vector<16x256xf32>
    %109 = vector.broadcast %7 : vector<1x256xf32> to vector<16x256xf32>
    %110 = arith.mulf %108, %109 : vector<16x256xf32>
    %111 = arith.truncf %110 : vector<16x256xf32> to vector<16x256xbf16>
    %112 = arith.truncf %103 : vector<16x256xf32> to vector<16x256xbf16>
    %cst_41 = arith.constant 0.000000e+00 : f32
    %113 = vector.broadcast %cst_41 : f32 to vector<16x1xf32>
    %114 = vector.extract_strided_slice %103 {offsets = [0, 1], sizes = [16, 255], strides = [1, 1]} : vector<16x256xf32> to vector<16x255xf32>
    %115 = tpu.concatenate %114, %113 in 1 : vector<16x255xf32>, vector<16x1xf32> -> vector<16x256xf32>
    %116 = vector.broadcast %8 : vector<1x256xf32> to vector<16x256xf32>
    %117 = arith.mulf %115, %116 : vector<16x256xf32>
    %118 = arith.truncf %117 : vector<16x256xf32> to vector<16x256xbf16>
    %cst_42 = arith.constant 0.000000e+00 : bf16
    %119 = vector.broadcast %cst_42 : bf16 to vector<16x16xbf16>
    %120 = vector.extract_strided_slice %111 {offsets = [0, 0], sizes = [16, 240], strides = [1, 1]} : vector<16x256xbf16> to vector<16x240xbf16>
    %121 = tpu.concatenate %119, %120 in 1 : vector<16x16xbf16>, vector<16x240xbf16> -> vector<16x256xbf16>
    %cst_43 = arith.constant 0.000000e+00 : bf16
    %122 = vector.broadcast %cst_43 : bf16 to vector<16x16xbf16>
    %123 = vector.extract_strided_slice %112 {offsets = [0, 0], sizes = [16, 240], strides = [1, 1]} : vector<16x256xbf16> to vector<16x240xbf16>
    %124 = tpu.concatenate %122, %123 in 1 : vector<16x16xbf16>, vector<16x240xbf16> -> vector<16x256xbf16>
    %cst_44 = arith.constant 0.000000e+00 : bf16
    %125 = vector.broadcast %cst_44 : bf16 to vector<16x16xbf16>
    %126 = vector.extract_strided_slice %118 {offsets = [0, 0], sizes = [16, 240], strides = [1, 1]} : vector<16x256xbf16> to vector<16x240xbf16>
    %127 = tpu.concatenate %125, %126 in 1 : vector<16x16xbf16>, vector<16x240xbf16> -> vector<16x256xbf16>
    %cst_45 = arith.constant 0.000000e+00 : bf16
    %128 = vector.broadcast %cst_45 : bf16 to vector<16x16xbf16>
    %129 = vector.extract_strided_slice %111 {offsets = [0, 16], sizes = [16, 240], strides = [1, 1]} : vector<16x256xbf16> to vector<16x240xbf16>
    %130 = tpu.concatenate %129, %128 in 1 : vector<16x240xbf16>, vector<16x16xbf16> -> vector<16x256xbf16>
    %cst_46 = arith.constant 0.000000e+00 : bf16
    %131 = vector.broadcast %cst_46 : bf16 to vector<16x16xbf16>
    %132 = vector.extract_strided_slice %112 {offsets = [0, 16], sizes = [16, 240], strides = [1, 1]} : vector<16x256xbf16> to vector<16x240xbf16>
    %133 = tpu.concatenate %132, %131 in 1 : vector<16x240xbf16>, vector<16x16xbf16> -> vector<16x256xbf16>
    %cst_47 = arith.constant 0.000000e+00 : bf16
    %134 = vector.broadcast %cst_47 : bf16 to vector<16x16xbf16>
    %135 = vector.extract_strided_slice %118 {offsets = [0, 16], sizes = [16, 240], strides = [1, 1]} : vector<16x256xbf16> to vector<16x240xbf16>
    %136 = tpu.concatenate %135, %134 in 1 : vector<16x240xbf16>, vector<16x16xbf16> -> vector<16x256xbf16>
    %137 = tpu.concatenate %121, %124, %127, %111, %112, %118, %130, %133, %136 in 0 : vector<16x256xbf16>, vector<16x256xbf16>, vector<16x256xbf16>, vector<16x256xbf16>, vector<16x256xbf16>, vector<16x256xbf16>, vector<16x256xbf16>, vector<16x256xbf16>, vector<16x256xbf16> -> vector<144x256xbf16>
    %cst_48 = arith.constant dense<0.000000e+00> : vector<16x256xf32>
    %138 = tpu.matmul %10, %137, %cst_48 {dimension_numbers = #tpu.dot_dimension_numbers<[1], [0], [0], [1], [0, 0, 1, 1], [], []>} : vector<16x144xbf16>, vector<144x256xbf16>, vector<16x256xf32> -> vector<16x256xf32>
    %139 = vector.broadcast %6 : vector<16x1xf32> to vector<16x256xf32>
    %140 = arith.addf %138, %139 : vector<16x256xf32>
    %141 = arith.addf %105, %140 : vector<16x256xf32>
    %c0_49 = arith.constant 0 : index
    %c0_50 = arith.constant 0 : index
    %c0_51 = arith.constant 0 : index
    %142 = vector.load %arg8[%c0_49, %c0_50, %c0_51] : memref<2x16x256xf32, #tpu.memory_space<vmem>>, vector<1x16x256xf32>
    %143 = vector.shape_cast %142 : vector<1x16x256xf32> to vector<16x256xf32>
    %144 = vector.shape_cast %141 : vector<16x256xf32> to vector<1x16x256xf32>
    tpu.vector_store %arg8[%c0_49, %c0_50, %c0_51], %144 {strides = array<i32>} : memref<2x16x256xf32, #tpu.memory_space<vmem>>, vector<1x16x256xf32>,
    %c1_52 = arith.constant 1 : index
    %c0_53 = arith.constant 0 : index
    %c0_54 = arith.constant 0 : index
    %145 = vector.load %arg1[%c1_52, %c0_53, %c0_54] : memref<2x8x256xf32, #tpu.memory_space<vmem>>, vector<1x8x256xf32>
    %146 = vector.shape_cast %145 : vector<1x8x256xf32> to vector<8x256xf32>
    %cst_55 = arith.constant dense<0.000000e+00> : vector<8xf32>
    %147 = vector.multi_reduction <add>, %146, %cst_55 [1] : vector<8x256xf32> to vector<8xf32>
    %148 = vector.shape_cast %147 : vector<8xf32> to vector<8x1xf32>
    %149 = arith.mulf %146, %146 : vector<8x256xf32>
    %cst_56 = arith.constant dense<0.000000e+00> : vector<8xf32>
    %150 = vector.multi_reduction <add>, %149, %cst_56 [1] : vector<8x256xf32> to vector<8xf32>
    %151 = vector.shape_cast %150 : vector<8xf32> to vector<8x1xf32>
    %cst_57 = arith.constant 3.906250e-03 : f32
    %152 = vector.broadcast %cst_57 : f32 to vector<8x1xf32>
    %153 = arith.mulf %148, %152 : vector<8x1xf32>
    %cst_58 = arith.constant 3.906250e-03 : f32
    %154 = vector.broadcast %cst_58 : f32 to vector<8x1xf32>
    %155 = arith.mulf %151, %154 : vector<8x1xf32>
    %156 = arith.mulf %153, %153 : vector<8x1xf32>
    %157 = arith.subf %155, %156 : vector<8x1xf32>
    %158 = vector.broadcast %153 : vector<8x1xf32> to vector<8x256xf32>
    %159 = arith.subf %146, %158 : vector<8x256xf32>
    %cst_59 = arith.constant 9.99999974E-6 : f32
    %160 = vector.broadcast %cst_59 : f32 to vector<8x1xf32>
    %161 = arith.addf %157, %160 : vector<8x1xf32>
    %162 = math.rsqrt %161 : vector<8x1xf32>
    %163 = arith.mulf %162, %1 : vector<8x1xf32>
    %164 = vector.broadcast %163 : vector<8x1xf32> to vector<8x256xf32>
    %165 = arith.mulf %159, %164 : vector<8x256xf32>
    %166 = vector.broadcast %2 : vector<8x1xf32> to vector<8x256xf32>
    %167 = arith.addf %165, %166 : vector<8x256xf32>
    %cst_60 = arith.constant 0.000000e+00 : f32
    %168 = vector.broadcast %cst_60 : f32 to vector<8x256xf32>
    %169 = arith.cmpf ogt, %167, %168 : vector<8x256xf32>
    %cst_61 = arith.constant 0.00999999977 : f32
    %170 = vector.broadcast %cst_61 : f32 to vector<8x256xf32>
    %171 = arith.mulf %170, %167 : vector<8x256xf32>
    %172 = arith.select %169, %167, %171 : vector<8x256xi1>, vector<8x256xf32>
    %cst_62 = arith.constant 0.000000e+00 : f32
    %173 = vector.broadcast %cst_62 : f32 to vector<8x1xf32>
    %174 = vector.extract_strided_slice %172 {offsets = [0, 0], sizes = [8, 255], strides = [1, 1]} : vector<8x256xf32> to vector<8x255xf32>
    %175 = tpu.concatenate %173, %174 in 1 : vector<8x1xf32>, vector<8x255xf32> -> vector<8x256xf32>
    %176 = vector.broadcast %7 : vector<1x256xf32> to vector<8x256xf32>
    %177 = arith.mulf %175, %176 : vector<8x256xf32>
    %178 = arith.truncf %177 : vector<8x256xf32> to vector<8x256xbf16>
    %179 = arith.truncf %172 : vector<8x256xf32> to vector<8x256xbf16>
    %cst_63 = arith.constant 0.000000e+00 : f32
    %180 = vector.broadcast %cst_63 : f32 to vector<8x1xf32>
    %181 = vector.extract_strided_slice %172 {offsets = [0, 1], sizes = [8, 255], strides = [1, 1]} : vector<8x256xf32> to vector<8x255xf32>
    %182 = tpu.concatenate %181, %180 in 1 : vector<8x255xf32>, vector<8x1xf32> -> vector<8x256xf32>
    %183 = vector.broadcast %8 : vector<1x256xf32> to vector<8x256xf32>
    %184 = arith.mulf %182, %183 : vector<8x256xf32>
    %185 = arith.truncf %184 : vector<8x256xf32> to vector<8x256xbf16>
    %cst_64 = arith.constant 0.000000e+00 : bf16
    %186 = vector.broadcast %cst_64 : bf16 to vector<8x16xbf16>
    %187 = vector.extract_strided_slice %178 {offsets = [0, 0], sizes = [8, 240], strides = [1, 1]} : vector<8x256xbf16> to vector<8x240xbf16>
    %188 = tpu.concatenate %186, %187 in 1 : vector<8x16xbf16>, vector<8x240xbf16> -> vector<8x256xbf16>
    %cst_65 = arith.constant 0.000000e+00 : bf16
    %189 = vector.broadcast %cst_65 : bf16 to vector<8x16xbf16>
    %190 = vector.extract_strided_slice %179 {offsets = [0, 0], sizes = [8, 240], strides = [1, 1]} : vector<8x256xbf16> to vector<8x240xbf16>
    %191 = tpu.concatenate %189, %190 in 1 : vector<8x16xbf16>, vector<8x240xbf16> -> vector<8x256xbf16>
    %cst_66 = arith.constant 0.000000e+00 : bf16
    %192 = vector.broadcast %cst_66 : bf16 to vector<8x16xbf16>
    %193 = vector.extract_strided_slice %185 {offsets = [0, 0], sizes = [8, 240], strides = [1, 1]} : vector<8x256xbf16> to vector<8x240xbf16>
    %194 = tpu.concatenate %192, %193 in 1 : vector<8x16xbf16>, vector<8x240xbf16> -> vector<8x256xbf16>
    %cst_67 = arith.constant 0.000000e+00 : bf16
    %195 = vector.broadcast %cst_67 : bf16 to vector<8x16xbf16>
    %196 = vector.extract_strided_slice %178 {offsets = [0, 16], sizes = [8, 240], strides = [1, 1]} : vector<8x256xbf16> to vector<8x240xbf16>
    %197 = tpu.concatenate %196, %195 in 1 : vector<8x240xbf16>, vector<8x16xbf16> -> vector<8x256xbf16>
    %cst_68 = arith.constant 0.000000e+00 : bf16
    %198 = vector.broadcast %cst_68 : bf16 to vector<8x16xbf16>
    %199 = vector.extract_strided_slice %179 {offsets = [0, 16], sizes = [8, 240], strides = [1, 1]} : vector<8x256xbf16> to vector<8x240xbf16>
    %200 = tpu.concatenate %199, %198 in 1 : vector<8x240xbf16>, vector<8x16xbf16> -> vector<8x256xbf16>
    %cst_69 = arith.constant 0.000000e+00 : bf16
    %201 = vector.broadcast %cst_69 : bf16 to vector<8x16xbf16>
    %202 = vector.extract_strided_slice %185 {offsets = [0, 16], sizes = [8, 240], strides = [1, 1]} : vector<8x256xbf16> to vector<8x240xbf16>
    %203 = tpu.concatenate %202, %201 in 1 : vector<8x240xbf16>, vector<8x16xbf16> -> vector<8x256xbf16>
    %204 = tpu.concatenate %188, %191, %194, %178, %179, %185, %197, %200, %203 in 0 : vector<8x256xbf16>, vector<8x256xbf16>, vector<8x256xbf16>, vector<8x256xbf16>, vector<8x256xbf16>, vector<8x256xbf16>, vector<8x256xbf16>, vector<8x256xbf16>, vector<8x256xbf16> -> vector<72x256xbf16>
    %cst_70 = arith.constant dense<0.000000e+00> : vector<16x256xf32>
    %205 = tpu.matmul %9, %204, %cst_70 {dimension_numbers = #tpu.dot_dimension_numbers<[1], [0], [0], [1], [0, 0, 1, 1], [], []>} : vector<16x72xbf16>, vector<72x256xbf16>, vector<16x256xf32> -> vector<16x256xf32>
    %206 = vector.broadcast %5 : vector<16x1xf32> to vector<16x256xf32>
    %207 = arith.addf %205, %206 : vector<16x256xf32>
    %c1_71 = arith.constant 1 : index
    %c0_72 = arith.constant 0 : index
    %c0_73 = arith.constant 0 : index
    %208 = vector.load %arg8[%c1_71, %c0_72, %c0_73] : memref<2x16x256xf32, #tpu.memory_space<vmem>>, vector<1x16x256xf32>
    %209 = vector.shape_cast %208 : vector<1x16x256xf32> to vector<16x256xf32>
    %210 = vector.shape_cast %207 : vector<16x256xf32> to vector<1x16x256xf32>
    tpu.vector_store %arg8[%c1_71, %c0_72, %c0_73], %210 {strides = array<i32>} : memref<2x16x256xf32, #tpu.memory_space<vmem>>, vector<1x16x256xf32>,
    %cst_74 = arith.constant dense<0.000000e+00> : vector<16xf32>
    %211 = vector.multi_reduction <add>, %207, %cst_74 [1] : vector<16x256xf32> to vector<16xf32>
    %212 = vector.shape_cast %211 : vector<16xf32> to vector<16x1xf32>
    %213 = arith.mulf %207, %207 : vector<16x256xf32>
    %cst_75 = arith.constant dense<0.000000e+00> : vector<16xf32>
    %214 = vector.multi_reduction <add>, %213, %cst_75 [1] : vector<16x256xf32> to vector<16xf32>
    %215 = vector.shape_cast %214 : vector<16xf32> to vector<16x1xf32>
    %216 = tpu.concatenate %212, %215 in 1 : vector<16x1xf32>, vector<16x1xf32> -> vector<16x2xf32>
    %cst_76 = arith.constant dense<0.000000e+00> : vector<16x2xf32>
    %217 = tpu.matmul %11, %216, %cst_76 {dimension_numbers = #tpu.dot_dimension_numbers<[1], [0], [0], [1], [0, 0, 1, 1], [], []>} : vector<16x16xf32>, vector<16x2xf32>, vector<16x2xf32> -> vector<16x2xf32>
    %218 = vector.extract_strided_slice %217 {offsets = [0, 0], sizes = [16, 1], strides = [1, 1]} : vector<16x2xf32> to vector<16x1xf32>
    %219 = vector.extract_strided_slice %217 {offsets = [0, 1], sizes = [16, 1], strides = [1, 1]} : vector<16x2xf32> to vector<16x1xf32>
    %220 = arith.mulf %218, %218 : vector<16x1xf32>
    %221 = arith.subf %219, %220 : vector<16x1xf32>
    %222 = vector.broadcast %218 : vector<16x1xf32> to vector<16x256xf32>
    %223 = arith.subf %207, %222 : vector<16x256xf32>
    %cst_77 = arith.constant 9.99999974E-6 : f32
    %224 = vector.broadcast %cst_77 : f32 to vector<16x1xf32>
    %225 = arith.addf %221, %224 : vector<16x1xf32>
    %226 = math.rsqrt %225 : vector<16x1xf32>
    %227 = arith.mulf %226, %3 : vector<16x1xf32>
    %228 = vector.broadcast %227 : vector<16x1xf32> to vector<16x256xf32>
    %229 = arith.mulf %223, %228 : vector<16x256xf32>
    %230 = vector.broadcast %4 : vector<16x1xf32> to vector<16x256xf32>
    %231 = arith.addf %229, %230 : vector<16x256xf32>
    %cst_78 = arith.constant 0.000000e+00 : f32
    %232 = vector.broadcast %cst_78 : f32 to vector<16x256xf32>
    %233 = arith.cmpf ogt, %231, %232 : vector<16x256xf32>
    %cst_79 = arith.constant 0.00999999977 : f32
    %234 = vector.broadcast %cst_79 : f32 to vector<16x256xf32>
    %235 = arith.mulf %234, %231 : vector<16x256xf32>
    %236 = arith.select %233, %231, %235 : vector<16x256xi1>, vector<16x256xf32>
    %c1_80 = arith.constant 1 : index
    %c0_81 = arith.constant 0 : index
    %c0_82 = arith.constant 0 : index
    %237 = vector.load %arg8[%c1_80, %c0_81, %c0_82] : memref<2x16x256xf32, #tpu.memory_space<vmem>>, vector<1x16x256xf32>
    %238 = vector.shape_cast %237 : vector<1x16x256xf32> to vector<16x256xf32>
    %cst_83 = arith.constant 0.000000e+00 : f32
    %239 = vector.broadcast %cst_83 : f32 to vector<16x1xf32>
    %240 = vector.extract_strided_slice %236 {offsets = [0, 0], sizes = [16, 255], strides = [1, 1]} : vector<16x256xf32> to vector<16x255xf32>
    %241 = tpu.concatenate %239, %240 in 1 : vector<16x1xf32>, vector<16x255xf32> -> vector<16x256xf32>
    %242 = vector.broadcast %7 : vector<1x256xf32> to vector<16x256xf32>
    %243 = arith.mulf %241, %242 : vector<16x256xf32>
    %244 = arith.truncf %243 : vector<16x256xf32> to vector<16x256xbf16>
    %245 = arith.truncf %236 : vector<16x256xf32> to vector<16x256xbf16>
    %cst_84 = arith.constant 0.000000e+00 : f32
    %246 = vector.broadcast %cst_84 : f32 to vector<16x1xf32>
    %247 = vector.extract_strided_slice %236 {offsets = [0, 1], sizes = [16, 255], strides = [1, 1]} : vector<16x256xf32> to vector<16x255xf32>
    %248 = tpu.concatenate %247, %246 in 1 : vector<16x255xf32>, vector<16x1xf32> -> vector<16x256xf32>
    %249 = vector.broadcast %8 : vector<1x256xf32> to vector<16x256xf32>
    %250 = arith.mulf %248, %249 : vector<16x256xf32>
    %251 = arith.truncf %250 : vector<16x256xf32> to vector<16x256xbf16>
    %cst_85 = arith.constant 0.000000e+00 : bf16
    %252 = vector.broadcast %cst_85 : bf16 to vector<16x16xbf16>
    %253 = vector.extract_strided_slice %244 {offsets = [0, 0], sizes = [16, 240], strides = [1, 1]} : vector<16x256xbf16> to vector<16x240xbf16>
    %254 = tpu.concatenate %252, %253 in 1 : vector<16x16xbf16>, vector<16x240xbf16> -> vector<16x256xbf16>
    %cst_86 = arith.constant 0.000000e+00 : bf16
    %255 = vector.broadcast %cst_86 : bf16 to vector<16x16xbf16>
    %256 = vector.extract_strided_slice %245 {offsets = [0, 0], sizes = [16, 240], strides = [1, 1]} : vector<16x256xbf16> to vector<16x240xbf16>
    %257 = tpu.concatenate %255, %256 in 1 : vector<16x16xbf16>, vector<16x240xbf16> -> vector<16x256xbf16>
    %cst_87 = arith.constant 0.000000e+00 : bf16
    %258 = vector.broadcast %cst_87 : bf16 to vector<16x16xbf16>
    %259 = vector.extract_strided_slice %251 {offsets = [0, 0], sizes = [16, 240], strides = [1, 1]} : vector<16x256xbf16> to vector<16x240xbf16>
    %260 = tpu.concatenate %258, %259 in 1 : vector<16x16xbf16>, vector<16x240xbf16> -> vector<16x256xbf16>
    %cst_88 = arith.constant 0.000000e+00 : bf16
    %261 = vector.broadcast %cst_88 : bf16 to vector<16x16xbf16>
    %262 = vector.extract_strided_slice %244 {offsets = [0, 16], sizes = [16, 240], strides = [1, 1]} : vector<16x256xbf16> to vector<16x240xbf16>
    %263 = tpu.concatenate %262, %261 in 1 : vector<16x240xbf16>, vector<16x16xbf16> -> vector<16x256xbf16>
    %cst_89 = arith.constant 0.000000e+00 : bf16
    %264 = vector.broadcast %cst_89 : bf16 to vector<16x16xbf16>
    %265 = vector.extract_strided_slice %245 {offsets = [0, 16], sizes = [16, 240], strides = [1, 1]} : vector<16x256xbf16> to vector<16x240xbf16>
    %266 = tpu.concatenate %265, %264 in 1 : vector<16x240xbf16>, vector<16x16xbf16> -> vector<16x256xbf16>
    %cst_90 = arith.constant 0.000000e+00 : bf16
    %267 = vector.broadcast %cst_90 : bf16 to vector<16x16xbf16>
    %268 = vector.extract_strided_slice %251 {offsets = [0, 16], sizes = [16, 240], strides = [1, 1]} : vector<16x256xbf16> to vector<16x240xbf16>
    %269 = tpu.concatenate %268, %267 in 1 : vector<16x240xbf16>, vector<16x16xbf16> -> vector<16x256xbf16>
    %270 = tpu.concatenate %254, %257, %260, %244, %245, %251, %263, %266, %269 in 0 : vector<16x256xbf16>, vector<16x256xbf16>, vector<16x256xbf16>, vector<16x256xbf16>, vector<16x256xbf16>, vector<16x256xbf16>, vector<16x256xbf16>, vector<16x256xbf16>, vector<16x256xbf16> -> vector<144x256xbf16>
    %cst_91 = arith.constant dense<0.000000e+00> : vector<16x256xf32>
    %271 = tpu.matmul %10, %270, %cst_91 {dimension_numbers = #tpu.dot_dimension_numbers<[1], [0], [0], [1], [0, 0, 1, 1], [], []>} : vector<16x144xbf16>, vector<144x256xbf16>, vector<16x256xf32> -> vector<16x256xf32>
    %272 = vector.broadcast %6 : vector<16x1xf32> to vector<16x256xf32>
    %273 = arith.addf %271, %272 : vector<16x256xf32>
    %274 = arith.addf %238, %273 : vector<16x256xf32>
    %c1_92 = arith.constant 1 : index
    %c0_93 = arith.constant 0 : index
    %c0_94 = arith.constant 0 : index
    %275 = vector.load %arg8[%c1_92, %c0_93, %c0_94] : memref<2x16x256xf32, #tpu.memory_space<vmem>>, vector<1x16x256xf32>
    %276 = vector.shape_cast %275 : vector<1x16x256xf32> to vector<16x256xf32>
    %277 = vector.shape_cast %274 : vector<16x256xf32> to vector<1x16x256xf32>
    tpu.vector_store %arg8[%c1_92, %c0_93, %c0_94], %277 {strides = array<i32>} : memref<2x16x256xf32, #tpu.memory_space<vmem>>, vector<1x16x256xf32>,
    return
  }
  func.func @transform_0(%arg0: i32) -> (i32, i32, i32) {
    %c0_i32 = arith.constant 0 : i32
    %c0_i32_0 = arith.constant 0 : i32
    %c0_i32_1 = arith.constant 0 : i32
    return %arg0, %c0_i32, %c0_i32_0 : i32, i32, i32
  }
  func.func @transform_1(%arg0: i32) -> (i32, i32) {
    %c0_i32 = arith.constant 0 : i32
    %c0_i32_0 = arith.constant 0 : i32
    %c0_i32_1 = arith.constant 0 : i32
    return %c0_i32, %c0_i32_0 : i32, i32
  }
  func.func @transform_2(%arg0: i32) -> (i32, i32) {
    %c0_i32 = arith.constant 0 : i32
    %c0_i32_0 = arith.constant 0 : i32
    %c0_i32_1 = arith.constant 0 : i32
    return %c0_i32, %c0_i32_0 : i32, i32
  }
  func.func @transform_3(%arg0: i32) -> (i32, i32) {
    %c0_i32 = arith.constant 0 : i32
    %c0_i32_0 = arith.constant 0 : i32
    %c0_i32_1 = arith.constant 0 : i32
    return %c0_i32, %c0_i32_0 : i32, i32
  }
  func.func @transform_4(%arg0: i32) -> (i32, i32) {
    %c0_i32 = arith.constant 0 : i32
    %c0_i32_0 = arith.constant 0 : i32
    %c0_i32_1 = arith.constant 0 : i32
    return %c0_i32, %c0_i32_0 : i32, i32
  }
  func.func @transform_5(%arg0: i32) -> (i32, i32) {
    %c0_i32 = arith.constant 0 : i32
    %c0_i32_0 = arith.constant 0 : i32
    %c0_i32_1 = arith.constant 0 : i32
    return %c0_i32, %c0_i32_0 : i32, i32
  }
  func.func @transform_6(%arg0: i32) -> (i32, i32) {
    %c0_i32 = arith.constant 0 : i32
    %c0_i32_0 = arith.constant 0 : i32
    %c0_i32_1 = arith.constant 0 : i32
    return %c0_i32, %c0_i32_0 : i32, i32
  }
  func.func @transform_7(%arg0: i32) -> (i32, i32, i32) {
    %c0_i32 = arith.constant 0 : i32
    %c0_i32_0 = arith.constant 0 : i32
    %c0_i32_1 = arith.constant 0 : i32
    return %arg0, %c0_i32, %c0_i32_0 : i32, i32, i32
  }
}

</mosaic_0001>

<bundles_post_ra>
// kernel: down_residual_block.1
= control target key start
LH: loop header
LB: loop body
LE: loop exit
PB: predicated region body
PF: predicated region fallthrough
CT: control target
= control target key end

     0   :  { %v1296_v6 = vmov 0   ;;  %v1297_v17 = vmov 1   ;;  %s1298_s29 = smov 1   ;;  %s1299_s30 = smov 127   ;;  %v89_v32 = vlaneseq  ;;  %vm83_vm2 = vcmask 7168   ;;  %s1875_s0 = inlined_call_operand.vmem [shape: f32[2,8,256], index: 0, kind: input, shape index: {}]   ;;  %s1876_s2 = inlined_call_operand.vmem [shape: f32[8,8], index: 2, kind: input, shape index: {}]   ;;  %s1877_s1 = inlined_call_operand.vmem [shape: f32[16,6], index: 1, kind: input, shape index: {}]   ;;  %s1878_s6 = inlined_call_operand.vmem [shape: f32[2,256], index: 6, kind: input, shape index: {}]   ;;  %s1879_s4 = inlined_call_operand.vmem [shape: bf16[16,72], index: 4, kind: input, shape index: {}]   ;;  %s1880_s3 = inlined_call_operand.vmem [shape: f32[16,16], index: 3, kind: input, shape index: {}]   ;;  %s1881_s5 = inlined_call_operand.vmem [shape: bf16[16,144], index: 5, kind: input, shape index: {}]   ;;  %s1882_s7 = inlined_call_operand.vmem [shape: f32[2,16,256], index: 7, kind: output, shape index: {}]  }
   0x1   :  { %v38_v0 = vld [vmem:[%s1875_s0] sm:$0xff]  ;;  %v39_v1 = vld [vmem:[%s1875_s0 + $0x8] sm:$0xff]  ;;  %1264 = vset.pattern.permute.xlu1 %v1296_v6  ;;  %1266 = vset.pattern.permute.xlu0 %v1296_v6  ;;  %s1300_s8 = smov 16   ;;  %vm109_vm3 = vcmask 1039360   ;;  %v1423_v58 = vld [vmem:[%s1875_s0 + $0x10] sm:$0xff]  ;;  %vm135_vm4 = vcmask 130048  }
   0x2   :  { %v40_v2 = vadd.f32 %v39_v1, %v38_v0  ;;  %v43_v3 = vmul.f32 %v38_v0, %v38_v0  ;;  %v44_v4 = vmul.f32 %v39_v1, %v39_v1  ;;  %277 = vmatprep.mubr.bf16.mxu0 %v1296_v6  ;;  %v1357_v14 = vld [vmem:[%s1877_s1] sm:$0xff]  ;;  %v90_v33 = vshrl.u32 %v89_v32, 7  ;;  %v1428_v59 = vld [vmem:[%s1875_s0 + $0x18] sm:$0xff] }
   0x3   :  { %v29_v36 = vld [vmem:[%s1878_s6] ss:$2 sm:$0x3]  ;;  %v1179_v45 = vld [vmem:[%s1878_s6 + $0x1] ss:$2 sm:$0x3]  ;;  %v658_v60 = vmul.f32 %v1423_v58, %v1423_v58  ;;  %v659_v61 = vmul.f32 %v1428_v59, %v1428_v59  ;;  %v655_v63 = vadd.f32 %v1428_v59, %v1423_v58 }
   0x4   :  { %41 = vadd.xlane.f32.xlu0 %v40_v2  ;;  %v45_v5 = vadd.f32 %v44_v4, %v43_v3  ;;  %v91_v34 = vsub.s32 0, %v90_v33  ;;  %v95_v35 = vsub.s32 1, %v90_v33  ;;  %s1301_s6 = smov 112   ;;  %vm192_vm5 = vcmask 1043456  }
   0x5   :  { %v660_v62 = vadd.f32 %v659_v61, %v658_v60  ;;  %vm163_vm6 = vcmask 916480   ;;  %vm236_vm7 = vcmask 588800  }
   0x6   :  { %v1381_v37 = vrot.slane %v29_v36, %v91_v34  ;;  %v1383_v38 = vrot.slane %v29_v36, %v95_v35  ;;  %v1400_v49 = vrot.slane %v1179_v45, %v95_v35  ;;  %v1402_v50 = vrot.slane %v1179_v45, %v91_v34 }
   0x8   :  { %46 = vadd.xlane.f32.xlu0 %v45_v5 }
  0x91   :  { %v42_v7 = vpop.xlane.xlu0 %41 }
  0x92   :  { %v48_v8 = vmul.f32 0.00390625, %v42_v7 }
  0x94   :  { %v50_v10 = vmul.f32 %v48_v8, %v48_v8  ;;  %v52_v19 = vsub.f32 %v38_v0, %v48_v8  ;;  %v53_v20 = vsub.f32 %v39_v1, %v48_v8  ;;  %v1302_v0 = vmov 4   ;;  %v1440_v1 = vld [vmem:[%s1877_s1 + $0x8] sm:$0xff] }
  0x95   :  { %v47_v9 = vpop.xlane.xlu0 %46 }
  0x96   :  { %v49_v11 = vmul.f32 0.00390625, %v47_v9 }
  0x98   :  { %v51_v12 = vsub.f32 %v49_v11, %v50_v10 }
  0x9a   :  { %v54_v13 = vadd.f32 1e-05, %v51_v12 }
  0x9c   :  { %1283 = vrsqrt.f32 %v54_v13 }
  0xa6   :  { %v1284_v15 = vpop.eup %1283 }
  0xa7   :  { %v56_v16 = vmul.f32 %v1284_v15, %v1357_v14 }
  0xa9   :  { %59 = vperm.xlu1 %1264, %v56_v16  }
  0xad   :  { %1265 = vset.pattern.permute.xlu1 %v1297_v17 }
  0xae   :  { %66 = vperm.xlu1 %1265, %v1357_v14  }
  0xb2   :  { %1267 = vset.pattern.permute.xlu1 %v1302_v0 }
 0x128   :  { %v60_v18 = vpop.permute.xlu1 %59 }
 0x129   :  { %v62_v21 = vmul.f32 %v60_v18, %v52_v19  ;;  %v63_v22 = vmul.f32 %v60_v18, %v53_v20 }
 0x12d   :  { %v1362_v23 = vpop.permute.xlu1 %66 }
 0x12e   :  { %v70_v24 = vadd.f32 %v1362_v23, %v63_v22  ;;  %v69_v25 = vadd.f32 %v1362_v23, %v62_v21 }
 0x130   :  { %vm72_vm0 = vcmp.gt.f32.partialorder %v70_v24, 0.0  ;;  %v74_v26 = vmul.f32 0.01, %v70_v24  ;;  %vm71_vm1 = vcmp.gt.f32.partialorder %v69_v25, 0.0  ;;  %v73_v27 = vmul.f32 0.01, %v69_v25 }
 0x132   :  { %v76_v28 = vsel %vm72_vm0, %v70_v24, %v74_v26  ;;  %v75_v29 = vsel %vm71_vm1, %v69_v25, %v73_v27 }
 0x133   :  { %81 = vrot.lane.b32.xlu1 %v76_v28, %s1298_s29  ;;  %79 = vrot.lane.b32.xlu0 %v75_v29, %s1298_s29  ;;  %v1370_v30 = vpack.c.bf16 %v75_v29, %v75_v29  ;;  %v1374_v31 = vpack.c.bf16 %v76_v28, %v76_v28 }
 0x137   :  { %105 = vrot.lane.b32.xlu1 %v75_v29, %s1299_s30 }
 0x13b   :  { %107 = vrot.lane.b32.xlu1 %v76_v28, %s1299_s30 }
 0x13f   :  { %143 = vrot.lane.b32.xlu1 %v1370_v30, %s1300_s8 }
 0x143   :  { %145 = vrot.lane.b32.xlu1 %v1374_v31, %s1300_s8 }
 0x1a5   :  { %v82_v39 = vpop.permute.xlu1 %81  ;;  %v80_v40 = vpop.permute.xlu0 %79 }
 0x1a6   :  { %v84_v41 = vsel %vm83_vm2, %v80_v40, %v82_v39  ;;  %v87_v42 = vsel %vm83_vm2, 0.0, %v80_v40 }
 0x1a7   :  { %v99_v43 = vmul.f32 %v1381_v37, %v87_v42  ;;  %v100_v44 = vmul.f32 %v1383_v38, %v84_v41 }
 0x1a9   :  { %v1392_v46 = vpack.c.bf16 %v99_v43, %v99_v43  ;;  %v1394_v47 = vpack.c.bf16 %v100_v44, %v100_v44  ;;  %v106_v48 = vpop.permute.xlu1 %105 }
 0x1ab   :  { %133 = vrot.lane.b32.xlu0 %v1394_v47, %s1300_s8  ;;  %131 = vrot.lane.b32.xlu1 %v1392_v46, %s1300_s8  ;;  %v186_v19 = vrot.slane %v1394_v47, 4  ;;  %v185_v20 = vrot.slane %v1392_v46, 4 }
 0x1ad   :  { %v108_v51 = vpop.permute.xlu1 %107 }
 0x1ae   :  { %v110_v52 = vsel %vm109_vm3, %v106_v48, %v108_v51  ;;  %v113_v53 = vsel %vm109_vm3, %v108_v51, 0.0  ;;  %v1473_v51 = vld [vmem:[%s1879_s4] sm:$0xff]  }
 0x1af   :  { %v126_v54 = vmul.f32 %v1400_v49, %v113_v53  ;;  %v125_v55 = vmul.f32 %v1402_v50, %v110_v52 }
 0x1b1   :  { %v128_v56 = vpack.c.bf16 %v126_v54, %v126_v54  ;;  %v127_v57 = vpack.c.bf16 %v125_v55, %v125_v55  ;;  %v144_v2 = vpop.permute.xlu1 %143 }
 0x1b2   :  { %v149_v4 = vsel %vm135_vm4, 0, %v144_v2 }
 0x1b3   :  { %154 = vrot.lane.b32.xlu0 %v128_v56, %s1300_s8  ;;  %152 = vrot.lane.b32.xlu1 %v127_v57, %s1300_s8  ;;  %v183_v7 = vrot.slane %v149_v4, 4  ;;  %v188_v21 = vrot.slane %v128_v56, 4  ;;  %v187_v27 = vrot.slane %v127_v57, 4 }
 0x1b5   :  { %v146_v3 = vpop.permute.xlu1 %145  ;;  %v213_v32 = vsel %vm192_vm5, %v1374_v31, %v188_v21  ;;  %v209_v35 = vsel %vm192_vm5, %v1370_v30, %v187_v27 }
 0x1b6   :  { %v147_v5 = vsel %vm135_vm4, %v144_v2, %v146_v3 }
 0x1b7   :  { %168 = vrot.lane.b32.xlu0 %v1370_v30, %s1301_s6  ;;  %170 = vrot.lane.b32.xlu1 %v1374_v31, %s1301_s6  ;;  %v184_v8 = vrot.slane %v147_v5, 4 }
 0x1bb   :  { %159 = vrot.lane.b32.xlu0 %v1392_v46, %s1301_s6  ;;  %161 = vrot.lane.b32.xlu1 %v1394_v47, %s1301_s6 }
 0x1bf   :  { %177 = vrot.lane.b32.xlu0 %v128_v56, %s1301_s6  ;;  %175 = vrot.lane.b32.xlu1 %v127_v57, %s1301_s6 }
 0x1de   :  { %661 = vadd.xlane.f32.xlu0 %v660_v62 }
 0x1e3   :  { %656 = vadd.xlane.f32.xlu1 %v655_v63 }
 0x1f4   :  { %223 = vperm.xlu1 %1267, %v1357_v14  }
 0x1f8   :  { %228 = vperm.xlu1 %1267, %v1440_v1  }
 0x1fc   :  { %1268 = vset.pattern.permute.xlu1 %v1296_v6 }
 0x21d   :  { %v134_v9 = vpop.permute.xlu0 %133  ;;  %v132_v10 = vpop.permute.xlu1 %131 }
 0x21e   :  { %v136_v11 = vsel %vm135_vm4, %v132_v10, %v134_v9  ;;  %v140_v12 = vsel %vm135_vm4, 0, %v132_v10 }
 0x21f   :  { %v198_v13 = vsel %vm192_vm5, %v136_v11, %v184_v8  ;;  %v194_v15 = vsel %vm192_vm5, %v140_v12, %v183_v7 }
 0x220   :  { %245 = vmatprep.subr.bf16.mxu0 %v198_v13 }
 0x221   :  { %246 = vmatpush1.bf16.msra.mxu0 %v194_v15 }
 0x225   :  { %v155_v16 = vpop.permute.xlu0 %154  ;;  %v153_v18 = vpop.permute.xlu1 %152 }
 0x226   :  { %v156_v22 = vsel %vm135_vm4, %v153_v18, %v155_v16  ;;  %v158_v24 = vsel %vm135_vm4, 0, %v153_v18 }
 0x227   :  { %v205_v25 = vsel %vm192_vm5, %v156_v22, %v186_v19  ;;  %v201_v26 = vsel %vm192_vm5, %v158_v24, %v185_v20 }
 0x228   :  { %247 = vmatprep.subr.bf16.mxu0 %v205_v25 }
 0x229   :  { %v169_v28 = vpop.permute.xlu0 %168  ;;  %248 = vmatpush1.bf16.msra.mxu0 %v201_v26  ;;  %v171_v29 = vpop.permute.xlu1 %170 }
 0x22a   :  { %v172_v33 = vsel %vm163_vm6, %v169_v28, %v171_v29  ;;  %v174_v34 = vsel %vm163_vm6, %v171_v29, 0  ;;  %249 = vmatprep.subr.bf16.mxu0 %v213_v32 }
 0x22b   :  { %v190_v36 = vrot.slane %v172_v33, 4  ;;  %v191_v39 = vrot.slane %v174_v34, 4 }
 0x22d   :  { %v160_v40 = vpop.permute.xlu0 %159  ;;  %v162_v41 = vpop.permute.xlu1 %161  ;;  %250 = vmatpush1.bf16.msra.mxu0 %v209_v35 }
 0x22e   :  { %v164_v42 = vsel %vm163_vm6, %v160_v40, %v162_v41  ;;  %v167_v43 = vsel %vm163_vm6, %v162_v41, 0 }
 0x22f   :  { %v220_v44 = vsel %vm192_vm5, %v167_v43, %v191_v39  ;;  %v217_v31 = vsel %vm192_vm5, %v164_v42, %v190_v36 }
 0x230   :  { %251 = vmatprep.subr.bf16.mxu0 %v220_v44 }
 0x231   :  { %v178_v45 = vpop.permute.xlu0 %177  ;;  %v176_v46 = vpop.permute.xlu1 %175  ;;  %252 = vmatpush1.bf16.msra.mxu0 %v217_v31 }
 0x232   :  { %v181_v47 = vsel %vm163_vm6, %v178_v45, 0  ;;  %v179_v30 = vsel %vm163_vm6, %v176_v46, %v178_v45 }
 0x233   :  { %1181 = vmatprep.subr.msk.bf16.mxu0 %vm192_vm5, %v181_v47  ;;  %v241_v48 = vsel %vm192_vm5, %v179_v30, 0 }
 0x235   :  { %254 = vmatpush1.bf16.msra.mxu0 %v241_v48 }
 0x238   :  { %1182 = vmatmul.mubr.msk.bf16.vlgmr.msra.gmra.mrb[0].mxu0 %vm236_vm7, %v1473_v51 }
 0x26b   :  { %v662_v52 = vpop.xlane.xlu0 %661 }
 0x26c   :  { %v664_v55 = vmul.f32 0.00390625, %v662_v52 }
 0x270   :  { %v657_v53 = vpop.xlane.xlu1 %656 }
 0x271   :  { %v663_v54 = vmul.f32 0.00390625, %v657_v53  ;;  %v1561_v53 = vld [vmem:[%s1880_s3] sm:$0xff] }
 0x272   :  { %1237 = vmatprep.mubr.msk.f32.mxu0 %vm135_vm4, %v1561_v53 }
 0x273   :  { %v665_v56 = vmul.f32 %v663_v54, %v663_v54  ;;  %v667_v63 = vsub.f32 %v1423_v58, %v663_v54  ;;  %v668_v0 = vsub.f32 %v1428_v59, %v663_v54 }
 0x274   :  { %v1496_v16 = vpop.permute.xlu1 %223 }
 0x275   :  { %v666_v57 = vsub.f32 %v664_v55, %v665_v56 }
 0x277   :  { %v669_v60 = vadd.f32 1e-05, %v666_v57 }
 0x278   :  { %v1498_v18 = vpop.permute.xlu1 %228 }
 0x279   :  { %1285 = vrsqrt.f32 %v669_v60 }
 0x283   :  { %v1286_v61 = vpop.eup %1285 }
 0x284   :  { %v671_v62 = vmul.f32 %v1286_v61, %v1357_v14 }
 0x286   :  { %674 = vperm.xlu0 %1266, %v671_v62  }
 0x305   :  { %v675_v2 = vpop.permute.xlu0 %674 }
 0x306   :  { %v677_v3 = vmul.f32 %v675_v2, %v667_v63  ;;  %v678_v4 = vmul.f32 %v675_v2, %v668_v0 }
 0x308   :  { %v679_v5 = vadd.f32 %v677_v3, %v1362_v23  ;;  %v680_v7 = vadd.f32 %v678_v4, %v1362_v23 }
 0x30a   :  { %vm681_vm8 = vcmp.gt.f32.partialorder %v679_v5, 0.0  ;;  %v683_v8 = vmul.f32 0.01, %v679_v5  ;;  %v684_v11 = vmul.f32 0.01, %v680_v7  ;;  %vm682_vm9 = vcmp.gt.f32.partialorder %v680_v7, 0.0 }
 0x30b   :  { %v279_v9 = vpop.f32.mrb[0].mxu0 }
 0x30c   :  { %v685_v10 = vsel %vm681_vm8, %v679_v5, %v683_v8  ;;  %v281_v12 = vpop.f32.mrb[1].mxu0  ;;  %v686_v15 = vsel %vm682_vm9, %v680_v7, %v684_v11  ;;  %v1525_v40 = vadd.f32 %v279_v9, %v1496_v16 }
 0x30d   :  { %689 = vrot.lane.b32.xlu1 %v685_v10, %s1298_s29  ;;  %v1483_v13 = vpack.c.bf16 %v685_v10, %v685_v10  ;;  %v283_v58 = vpop.f32.mrb[2].mxu0  ;;  %v1490_v23 = vpack.c.bf16 %v686_v15, %v686_v15  ;;  %v1528_v41 = vadd.f32 %v281_v12, %v1496_v16 }
 0x30e   :  { %v285_v59 = vpop.f32.mrb[3].mxu0  ;;  %v1531_v42 = vadd.f32 %v283_v58, %v1498_v18  ;;  %v298_v31 = vmul.f32 %v1525_v40, %v1525_v40 }
 0x30f   :  { %726 = vrot.lane.b32.xlu0 %v1483_v13, %s1300_s8  ;;  %v1534_v43 = vadd.f32 %v285_v59, %v1498_v18  ;;  %v299_v45 = vmul.f32 %v1528_v41, %v1528_v41  ;;  %v292_v47 = vadd.f32 %v1528_v41, %v1525_v40 }
 0x310   :  { %v300_v30 = vmul.f32 %v1531_v42, %v1531_v42 }
 0x311   :  { %691 = vrot.lane.b32.xlu1 %v686_v15, %s1298_s29  ;;  %v295_v44 = vadd.f32 %v1534_v43, %v1531_v42  ;;  %v302_v46 = vadd.f32 %v299_v45, %v298_v31  ;;  %v301_v48 = vmul.f32 %v1534_v43, %v1534_v43 }
 0x313   :  { %v305_v52 = vadd.f32 %v301_v48, %v300_v30 }
 0x315   :  { %703 = vrot.lane.b32.xlu1 %v685_v10, %s1299_s30 }
 0x319   :  { %705 = vrot.lane.b32.xlu1 %v686_v15, %s1299_s30  ;;  %v1575_v15 = vld [vmem:[%s1880_s3 + $0x8] sm:$0xff] }
 0x31d   :  { %728 = vrot.lane.b32.xlu1 %v1490_v23, %s1300_s8 }
 0x321   :  { %751 = vrot.lane.b32.xlu1 %v1490_v23, %s1301_s6 }
 0x37f   :  { %v690_v19 = vpop.permute.xlu1 %689 }
 0x380   :  { %v696_v20 = vsel %vm83_vm2, 0.0, %v690_v19 }
 0x381   :  { %v697_v21 = vmul.f32 %v696_v20, %v1381_v37  ;;  %v727_v56 = vpop.permute.xlu0 %726 }
 0x382   :  { %v732_v11 = vsel %vm135_vm4, 0, %v727_v56 }
 0x383   :  { %v1502_v22 = vpack.c.bf16 %v697_v21, %v697_v21  ;;  %v692_v24 = vpop.permute.xlu1 %691 }
 0x384   :  { %v693_v25 = vsel %vm83_vm2, %v690_v19, %v692_v24  ;;  %v764_v19 = vrot.slane %v732_v11, 4 }
 0x385   :  { %v698_v26 = vmul.f32 %v693_v25, %v1383_v38  ;;  %717 = vrot.lane.b32.xlu1 %v1502_v22, %s1300_s8 }
 0x387   :  { %v1508_v27 = vpack.c.bf16 %v698_v26, %v698_v26  ;;  %v704_v28 = vpop.permute.xlu1 %703 }
 0x389   :  { %719 = vrot.lane.b32.xlu0 %v1508_v27, %s1300_s8  ;;  %v767_v24 = vrot.slane %v1508_v27, 4 }
 0x38b   :  { %v706_v29 = vpop.permute.xlu1 %705 }
 0x38c   :  { %v707_v32 = vsel %vm109_vm3, %v704_v28, %v706_v29  ;;  %v710_v33 = vsel %vm109_vm3, %v706_v29, 0.0 }
 0x38d   :  { %v711_v34 = vmul.f32 %v707_v32, %v1402_v50  ;;  %v712_v35 = vmul.f32 %v710_v33, %v1400_v49  ;;  %v766_v32 = vrot.slane %v1502_v22, 4 }
 0x38f   :  { %v1516_v36 = vpack.c.bf16 %v711_v34, %v711_v34  ;;  %v1518_v39 = vpack.c.bf16 %v712_v35, %v712_v35  ;;  %v729_v54 = vpop.permute.xlu1 %728 }
 0x390   :  { %v730_v4 = vsel %vm135_vm4, %v727_v56, %v729_v54 }
 0x391   :  { %737 = vrot.lane.b32.xlu0 %v1518_v39, %s1300_s8  ;;  %735 = vrot.lane.b32.xlu1 %v1516_v36, %s1300_s8  ;;  %v765_v12 = vrot.slane %v730_v4, 4  ;;  %v769_v29 = vrot.slane %v1518_v39, 4  ;;  %v768_v33 = vrot.slane %v1516_v36, 4 }
 0x393   :  { %v752_v55 = vpop.permute.xlu1 %751 }
 0x3b0   :  { %296 = vadd.xlane.f32.xlu0 %v295_v44  ;;  %v793_v44 = vsel %vm192_vm5, %v1490_v23, %v769_v29 }
 0x3b4   :  { %303 = vadd.xlane.f32.xlu0 %v302_v46 }
 0x3b5   :  { %293 = vadd.xlane.f32.xlu1 %v292_v47 }
 0x3c6   :  { %744 = vrot.lane.b32.xlu1 %v1508_v27, %s1301_s6  ;;  %v755_v27 = vsel %vm163_vm6, %v752_v55, 0 }
 0x3ca   :  { %749 = vrot.lane.b32.xlu0 %v1483_v13, %s1301_s6 }
 0x3ce   :  { %742 = vrot.lane.b32.xlu0 %v1502_v22, %s1301_s6  ;;  %v789_v22 = vsel %vm192_vm5, %v1483_v13, %v768_v33 }
 0x3d2   :  { %758 = vrot.lane.b32.xlu0 %v1518_v39, %s1301_s6  ;;  %v772_v39 = vrot.slane %v755_v27, 4 }
 0x3ea   :  { %306 = vadd.xlane.f32.xlu1 %v305_v52 }
 0x3f7   :  { %v718_v57 = vpop.permute.xlu1 %717 }
 0x3f8   :  { %v723_v58 = vsel %vm135_vm4, 0, %v718_v57 }
 0x3f9   :  { %v774_v25 = vsel %vm192_vm5, %v723_v58, %v764_v19 }
 0x3fb   :  { %756 = vrot.lane.b32.xlu1 %v1516_v36, %s1301_s6  ;;  %v720_v60 = vpop.permute.xlu0 %719 }
 0x3fc   :  { %v721_v9 = vsel %vm135_vm4, %v718_v57, %v720_v60 }
 0x3fd   :  { %v778_v59 = vsel %vm192_vm5, %v721_v9, %v765_v12 }
 0x403   :  { %v736_v61 = vpop.permute.xlu1 %735  ;;  %v738_v62 = vpop.permute.xlu0 %737 }
 0x404   :  { %v739_v20 = vsel %vm135_vm4, %v736_v61, %v738_v62  ;;  %v741_v26 = vsel %vm135_vm4, 0, %v736_v61 }
 0x405   :  { %v785_v28 = vsel %vm192_vm5, %v739_v20, %v767_v24  ;;  %v781_v35 = vsel %vm192_vm5, %v741_v26, %v766_v32 }
 0x43d   :  { %v297_v0 = vpop.xlane.xlu0 %296 }
 0x441   :  { %v304_v3 = vpop.xlane.xlu0 %303 }
 0x442   :  { %v294_v63 = vpop.xlane.xlu1 %293 }
 0x443   :  { %v308_v7 = vsel %vm83_vm2, %v294_v63, %v304_v3 }
 0x445   :  { %v750_v21 = vpop.permute.xlu0 %749 }
 0x446   :  { %v745_v2 = vpop.permute.xlu1 %744  ;;  %v753_v45 = vsel %vm163_vm6, %v750_v21, %v752_v55 }
 0x447   :  { %v748_v31 = vsel %vm163_vm6, %v745_v2, 0  ;;  %v771_v47 = vrot.slane %v753_v45, 4 }
 0x448   :  { %v800_v46 = vsel %vm192_vm5, %v748_v31, %v772_v39 }
 0x449   :  { %v743_v34 = vpop.permute.xlu0 %742 }
 0x44a   :  { %v746_v36 = vsel %vm163_vm6, %v743_v34, %v745_v2 }
 0x44b   :  { %v797_v23 = vsel %vm192_vm5, %v746_v36, %v771_v47  ;;  %v1303_v36 = vmov 3  }
 0x44d   :  { %v759_v30 = vpop.permute.xlu0 %758 }
 0x44e   :  { %v762_v52 = vsel %vm163_vm6, %v759_v30, 0 }
 0x477   :  { %v307_v5 = vpop.xlane.xlu1 %306 }
 0x478   :  { %v309_v8 = vsel %vm83_vm2, %v297_v0, %v307_v5 }
 0x479   :  { %v1247_v10 = vpack.c.bf16 %v309_v8, %v308_v7 }
 0x47b   :  { %1248 = vmatprep.subr.bf16.mxu0 %v1247_v10  ;;  %v757_v48 = vpop.permute.xlu1 %756 }
 0x47c   :  { %1250 = vmatpush3.bf16.msra.mxu0 %v1247_v10  ;;  %v760_v54 = vsel %vm163_vm6, %v757_v48, %v759_v30 }
 0x47d   :  { %807 = vmatprep.subr.bf16.mxu0 %v778_v59  ;;  %v803_v13 = vsel %vm192_vm5, %v760_v54, 0 }
 0x47f   :  { %1238 = vmatmul.mubr.msk.f32.vlgmr.msra.gmra.mrb[4].mxu0 %vm135_vm4, %v1575_v15 }
 0x480   :  { %808 = vmatpush1.bf16.msra.mxu0 %v774_v25  ;;  %839 = vmatprep.mubr.bf16.mxu0 %v1296_v6 }
 0x481   :  { %809 = vmatprep.subr.bf16.mxu0 %v785_v28 }
 0x484   :  { %810 = vmatpush1.bf16.msra.mxu0 %v781_v35 }
 0x485   :  { %811 = vmatprep.subr.bf16.mxu0 %v793_v44 }
 0x488   :  { %812 = vmatpush1.bf16.msra.mxu0 %v789_v22 }
 0x489   :  { %813 = vmatprep.subr.bf16.mxu0 %v800_v46 }
 0x48c   :  { %814 = vmatpush1.bf16.msra.mxu0 %v797_v23 }
 0x48d   :  { %1199 = vmatprep.subr.msk.bf16.mxu0 %vm192_vm5, %v762_v52 }
 0x490   :  { %816 = vmatpush1.bf16.msra.mxu0 %v803_v13 }
 0x493   :  { %1200 = vmatmul.mubr.msk.bf16.vlgmr.msra.gmra.mrb[8].mxu0 %vm236_vm7, %v1473_v51 }
 0x494   :  { %1244 = vmatprep.mubr.msk.f32.mxu0 %vm135_vm4, %v1561_v53 }
 0x552   :  { %v1239_v55 = vpop.f32.mrb[4].mxu0 }
 0x553   :  { %v382_v56 = vpop.f32.mrb[5].mxu0  ;;  %v392_v9 = vmul.f32 %v1239_v55, %v1239_v55 }
 0x554   :  { %v391_v10 = vmul.f32 %v382_v56, %v382_v56 }
 0x566   :  { %v841_v57 = vpop.f32.mrb[8].mxu0 }
 0x567   :  { %v1608_v60 = vadd.f32 %v841_v57, %v1496_v16  ;;  %v843_v61 = vpop.f32.mrb[9].mxu0 }
 0x568   :  { %v1611_v62 = vadd.f32 %v843_v61, %v1496_v16  ;;  %v845_v63 = vpop.f32.mrb[10].mxu0 }
 0x569   :  { %v1614_v0 = vadd.f32 %v845_v63, %v1498_v18  ;;  %v847_v2 = vpop.f32.mrb[11].mxu0  ;;  %v861_v5 = vmul.f32 %v1608_v60, %v1608_v60 }
 0x56a   :  { %v1617_v51 = vadd.f32 %v847_v2, %v1498_v18  ;;  %v855_v53 = vadd.f32 %v1611_v62, %v1608_v60  ;;  %v862_v18 = vmul.f32 %v1611_v62, %v1611_v62 }
 0x56b   :  { %v863_v3 = vmul.f32 %v1614_v0, %v1614_v0 }
 0x56c   :  { %856 = vadd.xlane.f32.xlu1 %v855_v53  ;;  %v858_v4 = vadd.f32 %v1617_v51, %v1614_v0  ;;  %v864_v16 = vmul.f32 %v1617_v51, %v1617_v51  ;;  %v865_v8 = vadd.f32 %v862_v18, %v861_v5 }
 0x56e   :  { %859 = vadd.xlane.f32.xlu0 %v858_v4  ;;  %v868_v7 = vadd.f32 %v864_v16, %v863_v3 }
 0x570   :  { %869 = vadd.xlane.f32.xlu1 %v868_v7 }
 0x572   :  { %866 = vadd.xlane.f32.xlu0 %v865_v8 }
 0x581   :  { %397 = vrot.lane.b32.xlu1 %v392_v9, %s1298_s29 }
 0x585   :  { %421 = vrot.lane.b32.xlu1 %v1357_v14, %s1299_s30 }
 0x588   :  { %395 = vrot.lane.b32.xlu0 %v391_v10, %s1298_s29 }
 0x58c   :  { %423 = vrot.lane.b32.xlu0 %v1440_v1, %s1299_s30 }
 0x5f9   :  { %v857_v11 = vpop.xlane.xlu1 %856 }
 0x5fb   :  { %v860_v12 = vpop.xlane.xlu0 %859 }
 0x5fd   :  { %v870_v58 = vpop.xlane.xlu1 %869 }
 0x5fe   :  { %v872_v19 = vsel %vm83_vm2, %v860_v12, %v870_v58 }
 0x5ff   :  { %v867_v59 = vpop.xlane.xlu0 %866 }
 0x600   :  { %v871_v20 = vsel %vm83_vm2, %v857_v11, %v867_v59 }
 0x601   :  { %v1251_v21 = vpack.c.bf16 %v872_v19, %v871_v20  ;;  %v398_v24 = vpop.permute.xlu1 %397 }
 0x602   :  { %v402_v26 = vsub.f32 %v1239_v55, %v398_v24 }
 0x603   :  { %1252 = vmatprep.subr.bf16.mxu0 %v1251_v21  ;;  %v396_v25 = vpop.permute.xlu0 %395 }
 0x604   :  { %1254 = vmatpush3.bf16.msra.mxu0 %v1251_v21  ;;  %v401_v28 = vsub.f32 %v382_v56, %v396_v25  ;;  %v418_v29 = vadd.f32 1e-05, %v402_v26 }
 0x605   :  { %v422_v39 = vpop.permute.xlu1 %421 }
 0x606   :  { %v417_v32 = vadd.f32 1e-05, %v401_v28  ;;  %1287 = vrsqrt.f32 %v418_v29 }
 0x607   :  { %1245 = vmatmul.mubr.msk.f32.vlgmr.msra.gmra.mrb[6].mxu0 %vm135_vm4, %v1575_v15  ;;  %v424_v31 = vpop.permute.xlu0 %423 }
 0x608   :  { %1289 = vrsqrt.f32 %v417_v32 }
 0x610   :  { %v1288_v44 = vpop.eup %1287 }
 0x611   :  { %v428_v45 = vmul.f32 %v1288_v44, %v424_v31 }
 0x612   :  { %v1290_v15 = vpop.eup %1289 }
 0x613   :  { %v427_v22 = vmul.f32 %v1290_v15, %v422_v39 }
 0x6da   :  { %v1246_v33 = vpop.f32.mrb[6].mxu0 }
 0x6db   :  { %v949_v27 = vmul.f32 %v1246_v33, %v1246_v33  ;;  %v939_v34 = vpop.f32.mrb[7].mxu0 }
 0x6dc   :  { %v948_v35 = vmul.f32 %v939_v34, %v939_v34 }
 0x6dd   :  { %954 = vrot.lane.b32.xlu0 %v949_v27, %s1298_s29 }
 0x6de   :  { %952 = vrot.lane.b32.xlu1 %v948_v35, %s1298_s29 }
 0x6e1   :  { %410 = vperm.xlu0 %1266, %v1239_v55  }
 0x6e2   :  { %405 = vperm.xlu1 %1268, %v382_v56  }
 0x6e5   :  { %1270 = vset.pattern.permute.xlu0 %v1297_v17 }
 0x6e6   :  { %1269 = vset.pattern.permute.xlu1 %v1297_v17  ;;  %436 = vperm.xlu0 %1270, %v428_v45  }
 0x6e7   :  { %431 = vperm.xlu1 %1269, %v427_v22  }
 0x6ea   :  { %1272 = vset.pattern.permute.xlu0 %v1296_v6 }
 0x6eb   :  { %962 = vperm.xlu0 %1272, %v939_v34   ;;  %1271 = vset.pattern.permute.xlu1 %v1303_v36 }
 0x6ec   :  { %444 = vperm.xlu1 %1271, %v1357_v14  }
 0x6ef   :  { %1275 = vset.pattern.permute.xlu0 %v1297_v17 }
 0x6f0   :  { %448 = vperm.xlu1 %1271, %v1440_v1  }
 0x6f4   :  { %1273 = vset.pattern.permute.xlu1 %v1296_v6 }
 0x6f5   :  { %967 = vperm.xlu1 %1273, %v1246_v33  }
 0x6f9   :  { %1274 = vset.pattern.permute.xlu1 %v1297_v17 }
 0x74f   :  { %v955_v46 = vpop.permute.xlu0 %954 }
 0x750   :  { %v959_v47 = vsub.f32 %v1246_v33, %v955_v46  ;;  %v953_v30 = vpop.permute.xlu1 %952 }
 0x751   :  { %v958_v48 = vsub.f32 %v939_v34, %v953_v30 }
 0x752   :  { %v975_v23 = vadd.f32 1e-05, %v959_v47 }
 0x753   :  { %v974_v52 = vadd.f32 1e-05, %v958_v48 }
 0x754   :  { %1291 = vrsqrt.f32 %v975_v23 }
 0x755   :  { %1293 = vrsqrt.f32 %v974_v52 }
 0x75e   :  { %v1292_v54 = vpop.eup %1291 }
 0x75f   :  { %v1294_v13 = vpop.eup %1293  ;;  %v979_v14 = vmul.f32 %v1292_v54, %v424_v31 }
 0x760   :  { %v978_v55 = vmul.f32 %v1294_v13, %v422_v39  ;;  %v411_v57 = vpop.permute.xlu0 %410 }
 0x761   :  { %987 = vperm.xlu0 %1275, %v979_v14   ;;  %v406_v56 = vpop.permute.xlu1 %405  ;;  %v415_v16 = vsub.f32 %v1531_v42, %v411_v57  ;;  %v416_v5 = vsub.f32 %v1534_v43, %v411_v57 }
 0x762   :  { %982 = vperm.xlu1 %1274, %v978_v55   ;;  %v413_v61 = vsub.f32 %v1525_v40, %v406_v56  ;;  %v414_v63 = vsub.f32 %v1528_v41, %v406_v56 }
 0x765   :  { %v437_v3 = vpop.permute.xlu0 %436 }
 0x766   :  { %v432_v6 = vpop.permute.xlu1 %431  ;;  %v441_v8 = vmul.f32 %v437_v3, %v415_v16  ;;  %v442_v9 = vmul.f32 %v437_v3, %v416_v5 }
 0x767   :  { %v439_v2 = vmul.f32 %v432_v6, %v413_v61  ;;  %v440_v53 = vmul.f32 %v432_v6, %v414_v63 }
 0x76a   :  { %v963_v32 = vpop.permute.xlu0 %962 }
 0x76b   :  { %v445_v4 = vpop.permute.xlu1 %444  ;;  %v970_v35 = vsub.f32 %v1608_v60, %v963_v32  ;;  %v971_v44 = vsub.f32 %v1611_v62, %v963_v32 }
 0x76c   :  { %v451_v18 = vadd.f32 %v445_v4, %v439_v2  ;;  %v452_v7 = vadd.f32 %v445_v4, %v440_v53 }
 0x76e   :  { %vm455_vm10 = vcmp.gt.f32.partialorder %v451_v18, 0.0  ;;  %v459_v10 = vmul.f32 0.01, %v451_v18  ;;  %v460_v19 = vmul.f32 0.01, %v452_v7  ;;  %vm456_vm11 = vcmp.gt.f32.partialorder %v452_v7, 0.0 }
 0x76f   :  { %v449_v11 = vpop.permute.xlu1 %448 }
 0x770   :  { %v453_v12 = vadd.f32 %v449_v11, %v441_v8  ;;  %v454_v58 = vadd.f32 %v449_v11, %v442_v9  ;;  %v463_v59 = vsel %vm455_vm10, %v451_v18, %v459_v10  ;;  %v464_v24 = vsel %vm456_vm11, %v452_v7, %v460_v19 }
 0x771   :  { %475 = vrot.lane.b32.xlu1 %v463_v59, %s1298_s29 }
 0x772   :  { %vm457_vm12 = vcmp.gt.f32.partialorder %v453_v12, 0.0  ;;  %v461_v20 = vmul.f32 0.01, %v453_v12  ;;  %vm458_vm13 = vcmp.gt.f32.partialorder %v454_v58, 0.0  ;;  %v462_v21 = vmul.f32 0.01, %v454_v58 }
 0x774   :  { %v465_v25 = vsel %vm457_vm12, %v453_v12, %v461_v20  ;;  %v466_v26 = vsel %vm458_vm13, %v454_v58, %v462_v21  ;;  %v968_v33 = vpop.permute.xlu1 %967 }
 0x775   :  { %477 = vrot.lane.b32.xlu1 %v464_v24, %s1298_s29  ;;  %479 = vrot.lane.b32.xlu0 %v465_v25, %s1298_s29  ;;  %v1658_v28 = vpack.c.bf16 %v465_v25, %v463_v59  ;;  %v1660_v29 = vpack.c.bf16 %v466_v26, %v464_v24  ;;  %v972_v27 = vsub.f32 %v1614_v0, %v968_v33 }
 0x776   :  { %v973_v34 = vsub.f32 %v1617_v51, %v968_v33 }
 0x779   :  { %481 = vrot.lane.b32.xlu1 %v466_v26, %s1298_s29  ;;  %499 = vrot.lane.b32.xlu0 %v463_v59, %s1299_s30 }
 0x77d   :  { %501 = vrot.lane.b32.xlu1 %v464_v24, %s1299_s30  ;;  %503 = vrot.lane.b32.xlu0 %v465_v25, %s1299_s30 }
 0x781   :  { %505 = vrot.lane.b32.xlu1 %v466_v26, %s1299_s30 }
 0x7e0   :  { %v988_v31 = vpop.permute.xlu0 %987 }
 0x7e1   :  { %v992_v15 = vmul.f32 %v988_v31, %v972_v27  ;;  %v993_v39 = vmul.f32 %v988_v31, %v973_v34  ;;  %v983_v45 = vpop.permute.xlu1 %982  ;;  %v1734_v31 = vld [vmem:[%s1881_s5 + $0x4] ss:$8 sps:$4 sm:$0xff]  }
 0x7e2   :  { %v990_v22 = vmul.f32 %v983_v45, %v970_v35  ;;  %v991_v36 = vmul.f32 %v983_v45, %v971_v44  ;;  %1196 = vmatprep.mubr.msk.bf16.mxu1 %vm135_vm4, %v1734_v31 }
 0x7e3   :  { %v996_v46 = vadd.f32 %v992_v15, %v449_v11  ;;  %v997_v47 = vadd.f32 %v993_v39, %v449_v11 }
 0x7e4   :  { %v994_v30 = vadd.f32 %v990_v22, %v445_v4  ;;  %v995_v48 = vadd.f32 %v991_v36, %v445_v4 }
 0x7e5   :  { %v476_v23 = vpop.permute.xlu1 %475  ;;  %vm1001_vm14 = vcmp.gt.f32.partialorder %v997_v47, 0.0  ;;  %v1005_v52 = vmul.f32 0.01, %v997_v47  ;;  %vm1000_vm15 = vcmp.gt.f32.partialorder %v996_v46, 0.0  ;;  %v1004_v54 = vmul.f32 0.01, %v996_v46 }
 0x7e6   :  { %vm999_vm0 = vcmp.gt.f32.partialorder %v995_v48, 0.0  ;;  %v1003_v13 = vmul.f32 0.01, %v995_v48  ;;  %vm998_vm1 = vcmp.gt.f32.partialorder %v994_v30, 0.0  ;;  %v1002_v56 = vmul.f32 0.01, %v994_v30 }
 0x7e7   :  { %v1009_v14 = vsel %vm1001_vm14, %v997_v47, %v1005_v52  ;;  %v1008_v55 = vsel %vm1000_vm15, %v996_v46, %v1004_v54  ;;  %v480_v2 = vpop.permute.xlu0 %479  ;;  %v489_v18 = vsel %vm83_vm2, 0.0, %v476_v23 }
 0x7e8   :  { %1024 = vrot.lane.b32.xlu1 %v1009_v14, %s1298_s29  ;;  %1022 = vrot.lane.b32.xlu0 %v1008_v55, %s1298_s29  ;;  %v1007_v57 = vsel %vm999_vm0, %v995_v48, %v1003_v13  ;;  %v1006_v63 = vsel %vm998_vm1, %v994_v30, %v1002_v56  ;;  %v490_v4 = vsel %vm83_vm2, 0.0, %v480_v2  ;;  %v491_v11 = vmul.f32 %v489_v18, %v1381_v37 }
 0x7e9   :  { %v478_v6 = vpop.permute.xlu1 %477  ;;  %v1673_v61 = vpack.c.bf16 %v1009_v14, %v1007_v57  ;;  %v1675_v53 = vpack.c.bf16 %v1008_v55, %v1006_v63  ;;  %v493_v9 = vmul.f32 %v490_v4, %v1381_v37 }
 0x7ea   :  { %v483_v7 = vsel %vm83_vm2, %v476_v23, %v478_v6 }
 0x7eb   :  { %v500_v5 = vpop.permute.xlu0 %499  ;;  %v492_v12 = vmul.f32 %v483_v7, %v1383_v38  ;;  %v1691_v19 = vpack.c.bf16 %v493_v9, %v491_v11 }
 0x7ec   :  { %1020 = vrot.lane.b32.xlu1 %v1007_v57, %s1298_s29  ;;  %1018 = vrot.lane.b32.xlu0 %v1006_v63, %s1298_s29 }
 0x7ed   :  { %v482_v3 = vpop.permute.xlu1 %481 }
 0x7ee   :  { %v484_v16 = vsel %vm83_vm2, %v480_v2, %v482_v3 }
 0x7ef   :  { %v494_v10 = vmul.f32 %v484_v16, %v1383_v38  ;;  %v504_v59 = vpop.permute.xlu0 %503 }
 0x7f0   :  { %1044 = vrot.lane.b32.xlu1 %v1007_v57, %s1299_s30  ;;  %1042 = vrot.lane.b32.xlu0 %v1006_v63, %s1299_s30  ;;  %v1304_v63 = vmov 5  }
 0x7f1   :  { %v502_v8 = vpop.permute.xlu1 %501  ;;  %v1693_v20 = vpack.c.bf16 %v494_v10, %v492_v12  ;;  %1276 = vset.pattern.permute.xlu0 %v1304_v63  ;;  %1277 = vset.pattern.permute.xlu1 %v1304_v63 }
 0x7f2   :  { %v507_v25 = vsel %vm109_vm3, %v500_v5, %v502_v8  ;;  %v513_v26 = vsel %vm109_vm3, %v502_v8, 0.0 }
 0x7f3   :  { %v515_v27 = vmul.f32 %v507_v25, %v1402_v50  ;;  %v516_v34 = vmul.f32 %v513_v26, %v1400_v49  ;;  %v1295_v25 = vld [vmem:[%s1877_s1] sm:$0xff] }
 0x7f4   :  { %1048 = vrot.lane.b32.xlu1 %v1009_v14, %s1299_s30  ;;  %1046 = vrot.lane.b32.xlu0 %v1008_v55, %s1299_s30 }
 0x7f5   :  { %v506_v58 = vpop.permute.xlu1 %505 }
 0x7f6   :  { %v508_v21 = vsel %vm109_vm3, %v504_v59, %v506_v58  ;;  %v514_v24 = vsel %vm109_vm3, %v506_v58, 0.0 }
 0x7f7   :  { %v517_v32 = vmul.f32 %v508_v21, %v1402_v50  ;;  %v518_v33 = vmul.f32 %v514_v24, %v1400_v49 }
 0x7f8   :  { %523 = vrot.lane.b32.xlu0 %v1691_v19, %s1300_s8  ;;  %525 = vrot.lane.b32.xlu1 %v1693_v20, %s1300_s8 }
 0x7f9   :  { %v1711_v35 = vpack.c.bf16 %v518_v33, %v516_v34  ;;  %v1713_v44 = vpack.c.bf16 %v517_v32, %v515_v27 }
 0x7fc   :  { %534 = vrot.lane.b32.xlu0 %v1658_v28, %s1300_s8  ;;  %536 = vrot.lane.b32.xlu1 %v1660_v29, %s1300_s8 }
 0x800   :  { %547 = vrot.lane.b32.xlu1 %v1711_v35, %s1300_s8  ;;  %545 = vrot.lane.b32.xlu0 %v1713_v44, %s1300_s8 }
 0x804   :  { %556 = vrot.lane.b32.xlu1 %v1693_v20, %s1301_s6  ;;  %554 = vrot.lane.b32.xlu0 %v1691_v19, %s1301_s6 }
 0x808   :  { %565 = vrot.lane.b32.xlu1 %v1660_v29, %s1301_s6  ;;  %563 = vrot.lane.b32.xlu0 %v1658_v28, %s1301_s6 }
 0x80c   :  { %574 = vrot.lane.b32.xlu1 %v1711_v35, %s1301_s6  ;;  %572 = vrot.lane.b32.xlu0 %v1713_v44, %s1301_s6 }
 0x85a   :  { %v1023_v15 = vpop.permute.xlu0 %1022  ;;  %v1025_v39 = vpop.permute.xlu1 %1024 }
 0x85b   :  { %v1033_v45 = vsel %vm83_vm2, 0.0, %v1023_v15  ;;  %v1027_v22 = vsel %vm83_vm2, %v1023_v15, %v1025_v39 }
 0x85c   :  { %v1036_v48 = vmul.f32 %v1033_v45, %v1381_v37  ;;  %v1037_v23 = vmul.f32 %v1027_v22, %v1383_v38 }
 0x85e   :  { %v1019_v36 = vpop.permute.xlu0 %1018  ;;  %v1021_v46 = vpop.permute.xlu1 %1020 }
 0x85f   :  { %v1032_v47 = vsel %vm83_vm2, 0.0, %v1019_v36  ;;  %v1026_v30 = vsel %vm83_vm2, %v1019_v36, %v1021_v46  ;;  %vm1772_vm2 = vmneg %vm135_vm4 }
 0x860   :  { %v1034_v52 = vmul.f32 %v1032_v47, %v1381_v37  ;;  %v1035_v54 = vmul.f32 %v1026_v30, %v1383_v38 }
 0x862   :  { %v1746_v13 = vpack.c.bf16 %v1037_v23, %v1035_v54  ;;  %v1043_v14 = vpop.permute.xlu0 %1042  ;;  %v1045_v55 = vpop.permute.xlu1 %1044  ;;  %v1748_v56 = vpack.c.bf16 %v1036_v48, %v1034_v52 }
 0x863   :  { %v1050_v57 = vsel %vm109_vm3, %v1043_v14, %v1045_v55  ;;  %v1056_v6 = vsel %vm109_vm3, %v1045_v55, 0.0 }
 0x864   :  { %1066 = vrot.lane.b32.xlu0 %v1748_v56, %s1300_s8  ;;  %1068 = vrot.lane.b32.xlu1 %v1746_v13, %s1300_s8  ;;  %v1058_v2 = vmul.f32 %v1050_v57, %v1402_v50  ;;  %v1059_v16 = vmul.f32 %v1056_v6, %v1400_v49 }
 0x866   :  { %v1047_v37 = vpop.permute.xlu0 %1046  ;;  %v1049_v38 = vpop.permute.xlu1 %1048 }
 0x867   :  { %v1051_v3 = vsel %vm109_vm3, %v1047_v37, %v1049_v38  ;;  %v1057_v4 = vsel %vm109_vm3, %v1049_v38, 0.0 }
 0x868   :  { %v1060_v5 = vmul.f32 %v1051_v3, %v1402_v50  ;;  %v1061_v18 = vmul.f32 %v1057_v4, %v1400_v49  ;;  %1077 = vrot.lane.b32.xlu0 %v1675_v53, %s1300_s8  ;;  %1079 = vrot.lane.b32.xlu1 %v1673_v61, %s1300_s8 }
 0x86a   :  { %v1766_v7 = vpack.c.bf16 %v1061_v18, %v1059_v16  ;;  %v524_v8 = vpop.permute.xlu0 %523  ;;  %v526_v9 = vpop.permute.xlu1 %525  ;;  %v1768_v10 = vpack.c.bf16 %v1060_v5, %v1058_v2 }
 0x86b   :  { %v527_v11 = vsel %vm135_vm4, %v524_v8, %v526_v9 }
 0x86c   :  { %1090 = vrot.lane.b32.xlu1 %v1766_v7, %s1300_s8  ;;  %1088 = vrot.lane.b32.xlu0 %v1768_v10, %s1300_s8 }
 0x86d   :  { %601 = vmatprep.subr.bf16.mxu1 %v527_v11 }
 0x86e   :  { %1188 = vmatpush1.bf16.msk.msra.mxu1 %vm1772_vm2, %v524_v8  ;;  %v535_v49 = vpop.permute.xlu0 %534  ;;  %v537_v50 = vpop.permute.xlu1 %536 }
 0x86f   :  { %v538_v58 = vsel %vm135_vm4, %v535_v49, %v537_v50 }
 0x870   :  { %1099 = vrot.lane.b32.xlu1 %v1746_v13, %s1301_s6  ;;  %1097 = vrot.lane.b32.xlu0 %v1748_v56, %s1301_s6 }
 0x871   :  { %603 = vmatprep.subr.bf16.mxu1 %v538_v58 }
 0x872   :  { %1190 = vmatpush1.bf16.msk.msra.mxu1 %vm1772_vm2, %v535_v49  ;;  %v546_v59 = vpop.permute.xlu0 %545  ;;  %v548_v21 = vpop.permute.xlu1 %547 }
 0x873   :  { %v549_v24 = vsel %vm135_vm4, %v546_v59, %v548_v21 }
 0x874   :  { %1108 = vrot.lane.b32.xlu1 %v1673_v61, %s1301_s6  ;;  %1106 = vrot.lane.b32.xlu0 %v1675_v53, %s1301_s6 }
 0x875   :  { %605 = vmatprep.subr.bf16.mxu1 %v549_v24 }
 0x876   :  { %1192 = vmatpush1.bf16.msk.msra.mxu1 %vm1772_vm2, %v546_v59  ;;  %v555_v26 = vpop.permute.xlu0 %554  ;;  %v557_v32 = vpop.permute.xlu1 %556 }
 0x877   :  { %607 = vmatprep.subr.bf16.mxu1 %v1693_v20  ;;  %v558_v20 = vsel %vm163_vm6, %v555_v26, %v557_v32 }
 0x878   :  { %1117 = vrot.lane.b32.xlu1 %v1766_v7, %s1301_s6  ;;  %1115 = vrot.lane.b32.xlu0 %v1768_v10, %s1301_s6 }
 0x87a   :  { %608 = vmatpush1.bf16.msra.mxu1 %v1691_v19  ;;  %v566_v19 = vpop.permute.xlu1 %565 }
 0x87b   :  { %609 = vmatprep.subr.bf16.mxu1 %v1660_v29  ;;  %v564_v29 = vpop.permute.xlu0 %563 }
 0x87c   :  { %582 = vperm.xlu0 %1276, %v1295_v25   ;;  %586 = vperm.xlu1 %1277, %v1440_v1   ;;  %v567_v1 = vsel %vm163_vm6, %v564_v29, %v566_v19 }
 0x87e   :  { %610 = vmatpush1.bf16.msra.mxu1 %v1658_v28  ;;  %v575_v27 = vpop.permute.xlu1 %574  ;;  %v1280_v28 = vld [vmem:[%s1881_s5] ss:$8 sps:$4 sm:$0xff]  }
 0x87f   :  { %611 = vmatprep.subr.bf16.mxu1 %v1711_v35  ;;  %v573_v33 = vpop.permute.xlu0 %572 }
 0x880   :  { %1278 = vset.pattern.permute.xlu0 %v1297_v17  ;;  %v576_v17 = vsel %vm163_vm6, %v573_v33, %v575_v27 }
 0x882   :  { %612 = vmatpush1.bf16.msra.mxu1 %v1713_v44 }
 0x883   :  { %1193 = vmatprep.subr.msk.bf16.mxu1 %vm163_vm6, %v557_v32 }
 0x886   :  { %614 = vmatpush1.bf16.msra.mxu1 %v558_v20 }
 0x887   :  { %1194 = vmatprep.subr.msk.bf16.mxu1 %vm163_vm6, %v566_v19 }
 0x88a   :  { %616 = vmatpush1.bf16.msra.mxu1 %v567_v1 }
 0x88b   :  { %1195 = vmatprep.subr.msk.bf16.mxu1 %vm163_vm6, %v575_v27 }
 0x88e   :  { %618 = vmatpush1.bf16.msra.mxu1 %v576_v17 }
 0x891   :  { %634 = vmatmul.mubr.bf16.vlgmr.msra.gmra.mrb[0].mxu1 %v1280_v28 }
 0x892   :  { %1220 = vmatprep.mubr.msk.bf16.mxu1 %vm135_vm4, %v1734_v31 }
 0x8d6   :  { %v1067_v34 = vpop.permute.xlu0 %1066  ;;  %v1069_v35 = vpop.permute.xlu1 %1068 }
 0x8d7   :  { %v1070_v44 = vsel %vm135_vm4, %v1067_v34, %v1069_v35 }
 0x8d8   :  { %1124 = vmatprep.subr.bf16.mxu1 %v1070_v44 }
 0x8d9   :  { %1212 = vmatpush1.bf16.msk.msra.mxu1 %vm1772_vm2, %v1067_v34 }
 0x8da   :  { %v1078_v15 = vpop.permute.xlu0 %1077  ;;  %v1080_v39 = vpop.permute.xlu1 %1079 }
 0x8db   :  { %v1081_v45 = vsel %vm135_vm4, %v1078_v15, %v1080_v39 }
 0x8dc   :  { %1126 = vmatprep.subr.bf16.mxu1 %v1081_v45 }
 0x8dd   :  { %1214 = vmatpush1.bf16.msk.msra.mxu1 %vm1772_vm2, %v1078_v15 }
 0x8de   :  { %v1089_v22 = vpop.permute.xlu0 %1088  ;;  %v1091_v36 = vpop.permute.xlu1 %1090 }
 0x8df   :  { %v1092_v31 = vsel %vm135_vm4, %v1089_v22, %v1091_v36 }
 0x8e0   :  { %1128 = vmatprep.subr.bf16.mxu1 %v1092_v31 }
 0x8e1   :  { %1216 = vmatpush1.bf16.msk.msra.mxu1 %vm1772_vm2, %v1089_v22 }
 0x8e2   :  { %1130 = vmatprep.subr.bf16.mxu1 %v1746_v13  ;;  %v1098_v46 = vpop.permute.xlu0 %1097  ;;  %v1100_v47 = vpop.permute.xlu1 %1099 }
 0x8e3   :  { %v1101_v23 = vsel %vm163_vm6, %v1098_v46, %v1100_v47 }
 0x8e5   :  { %1131 = vmatpush1.bf16.msra.mxu1 %v1748_v56 }
 0x8e6   :  { %1132 = vmatprep.subr.bf16.mxu1 %v1673_v61  ;;  %v1107_v30 = vpop.permute.xlu0 %1106  ;;  %v1109_v48 = vpop.permute.xlu1 %1108 }
 0x8e7   :  { %v1110_v52 = vsel %vm163_vm6, %v1107_v30, %v1109_v48 }
 0x8e9   :  { %1133 = vmatpush1.bf16.msra.mxu1 %v1675_v53 }
 0x8ea   :  { %1134 = vmatprep.subr.bf16.mxu1 %v1766_v7  ;;  %v1116_v61 = vpop.permute.xlu0 %1115  ;;  %v1118_v54 = vpop.permute.xlu1 %1117 }
 0x8eb   :  { %v1119_v53 = vsel %vm163_vm6, %v1116_v61, %v1118_v54 }
 0x8ed   :  { %1135 = vmatpush1.bf16.msra.mxu1 %v1768_v10 }
 0x8ee   :  { %1217 = vmatprep.subr.msk.bf16.mxu1 %vm163_vm6, %v1100_v47 }
 0x8f1   :  { %1137 = vmatpush1.bf16.msra.mxu1 %v1101_v23 }
 0x8f2   :  { %1218 = vmatprep.subr.msk.bf16.mxu1 %vm163_vm6, %v1109_v48 }
 0x8f5   :  { %1139 = vmatpush1.bf16.msra.mxu1 %v1110_v52 }
 0x8f6   :  { %1219 = vmatprep.subr.msk.bf16.mxu1 %vm163_vm6, %v1118_v54 }
 0x8f9   :  { %1141 = vmatpush1.bf16.msra.mxu1 %v1119_v53 }
 0x8fb   :  { %v583_v13 = vpop.permute.xlu0 %582  ;;  %v587_v55 = vpop.permute.xlu1 %586 }
 0x8fc   :  { %1157 = vmatmul.mubr.bf16.vlgmr.msra.gmra.mrb[4].mxu1 %v1280_v28 }
 0x964   :  { %v635_v14 = vpop.f32.mrb[0].mxu1 }
 0x965   :  { %v636_v56 = vadd.f32 %v635_v14, %v583_v13  ;;  %v637_v57 = vpop.f32.mrb[1].mxu1 }
 0x966   :  { %v638_v6 = vadd.f32 %v637_v57, %v583_v13  ;;  %v639_v63 = vpop.f32.mrb[2].mxu1 }
 0x967   :  { %v644_v37 = vadd.f32 %v636_v56, %v1525_v40  ;;  %v640_v38 = vadd.f32 %v639_v63, %v587_v55  ;;  %v641_v2 = vpop.f32.mrb[3].mxu1 }
 0x968   :  { %v645_v3 = vadd.f32 %v638_v6, %v1528_v41  ;;  %v642_v4 = vadd.f32 %v641_v2, %v587_v55 }
 0x969   :  { %648 = vst [vmem:[%s1882_s7] sm:$0xff] %v644_v37  ;;  %v646_v16 = vadd.f32 %v640_v38, %v1531_v42 }
 0x96a   :  { %649 = vst [vmem:[%s1882_s7 + $0x8] sm:$0xff] %v645_v3  ;;  %v647_v5 = vadd.f32 %v642_v4, %v1534_v43 }
 0x96b   :  { %650 = vst [vmem:[%s1882_s7 + $0x10] sm:$0xff] %v646_v16 }
 0x96c   :  { %651 = vst [vmem:[%s1882_s7 + $0x18] sm:$0xff] %v647_v5 }
 0x9cf   :  { %v1158_v40 = vpop.f32.mrb[4].mxu1 }
 0x9d0   :  { %v1159_v41 = vadd.f32 %v1158_v40, %v583_v13  ;;  %v1160_v18 = vpop.f32.mrb[5].mxu1 }
 0x9d1   :  { %v1161_v7 = vadd.f32 %v1160_v18, %v583_v13  ;;  %v1162_v8 = vpop.f32.mrb[6].mxu1 }
 0x9d2   :  { %v1167_v42 = vadd.f32 %v1159_v41, %v1608_v60  ;;  %v1163_v9 = vadd.f32 %v1162_v8, %v587_v55  ;;  %v1164_v10 = vpop.f32.mrb[7].mxu1 }
 0x9d3   :  { %v1168_v11 = vadd.f32 %v1161_v7, %v1611_v62  ;;  %v1165_v43 = vadd.f32 %v1164_v10, %v587_v55 }
 0x9d4   :  { %1221 = vst [vmem:[%s1882_s7 + $0x20] sm:$0xff] %v1167_v42  ;;  %v1169_v12 = vadd.f32 %v1163_v9, %v1614_v0 }
 0x9d5   :  { %1222 = vst [vmem:[%s1882_s7 + $0x28] sm:$0xff] %v1168_v11  ;;  %v1170_v49 = vadd.f32 %v1165_v43, %v1617_v51 }
 0x9d6   :  { %1223 = vst [vmem:[%s1882_s7 + $0x30] sm:$0xff] %v1169_v12 }
 0x9d7   :  { %1224 = vst [vmem:[%s1882_s7 + $0x38] sm:$0xff] %v1170_v49 }

</bundles_post_ra>
